<compile_context>
chip_gen: v6e
topology: v6e:2x2x1
jax: 0.10.0
libtpu: 0.0.40
codegen_flags: <defaults>
</compile_context>

<pallas_src>
import functools

import jax
import jax.numpy as jnp
from jax import lax
from jax.experimental import pallas as pl
from jax.experimental.pallas import tpu as pltpu


def _triplet_partials_kernel(margin, xq_ref, xk_ref, sqq_ref, sqk_ref,
                             labq_ref, labk_ref, haspos_ref,
                             hp_sq_ref, hn_all_ref, hn_semi_ref):
    inf = jnp.float32(jnp.inf)

    # Gram tile on the MXU (embeddings keep their native dtype, f32 accumulate).
    # TODO(synk): on v5e, consider an explicit bf16 cast of both operands here
    # (197 TF/s bf16 MXU) with a small mining-tie precision caveat.
    gram = lax.dot_general(xq_ref[...], xk_ref[...],
                           (((1,), (1,)), ((), ())),
                           preferred_element_type=jnp.float32)       # (Bq, Bp)

    # Squared Euclidean distances; pad columns carry sq_row = +inf -> d2 = +inf.
    d2 = jnp.maximum(sqq_ref[...] + sqk_ref[...] - 2.0 * gram, 0.0)  # (Bq, Bp)

    same = labk_ref[...] == labq_ref[...]                            # (Bq, Bp) bool

    # Hardest positive per anchor (squared space). The ~0 diagonal never beats
    # a real positive and is irrelevant otherwise.
    hp_sq = jnp.max(jnp.where(same, d2, 0.0), axis=1, keepdims=True)  # (Bq, 1)

    # Anchors with no same-label partner -> PyTorch's -10 sentinel.
    invalid = haspos_ref[...] == 0                                    # (Bq, 1)
    hp = jnp.where(invalid, jnp.float32(-10.0), jnp.sqrt(hp_sq))

    # Fused negative selection (semi-hard set is a subset of the negatives).
    t = jnp.where(same, inf, d2)                    # negatives keep d2, rest inf
    hn_all_sq = jnp.min(t, axis=1, keepdims=True)

    # Semi-hard window  hp < dist < hp + margin, evaluated in squared space.
    #   lower bound: valid -> d2 > hp^2 ; invalid (hp = -10) -> d2 > 0, which
    #   also reproduces the reference's "value == 0 -> inf" fixup.
    lb_sq = jnp.where(invalid, 0.0, hp_sq)
    ub = hp + margin
    ub_sq = jnp.where(ub > 0.0, ub * ub, -inf)      # ub <= 0 -> window empty
    t_semi = jnp.where(jnp.logical_and(t > lb_sq, t < ub_sq), t, inf)
    hn_semi_sq = jnp.min(t_semi, axis=1, keepdims=True)

    hp_sq_ref[...] = hp_sq
    hn_all_ref[...] = hn_all_sq
    hn_semi_ref[...] = hn_semi_sq


def triplet_loss(embeddings, labels, margin=1.0, block_q=128):
    """embeddings: (B, D) float32/bf16, labels: (B,) int.

    Returns (loss, num_valid_triplets), matching TripletLoss.forward.
    """
    B, D = embeddings.shape
    margin = float(margin)
    lab = labels.astype(jnp.int32)

    # ---------- plain-XLA prep: positive counts, padding, row norms ----------
    has_pos = (jnp.sum((lab[None, :] == lab[:, None]).astype(jnp.int32), axis=1)
               > 1).astype(jnp.int32)                      # excludes self

    Bq = max(int(block_q), 128)                            # 128: safe on v7x/v5e; 256+ on v6e
    B_pad = pl.cdiv(B, Bq) * Bq
    D_pad = pl.cdiv(D, 128) * 128
    pad_b, pad_d = B_pad - B, D_pad - D

    x_pad = jnp.pad(embeddings, ((0, pad_b), (0, pad_d)))
    sentinel = jnp.max(lab) + 1                            # never equals a real label
    lab_pad = jnp.concatenate(
        [lab, jnp.broadcast_to(sentinel, (pad_b,)).astype(jnp.int32)])
    has_pos_pad = jnp.concatenate([has_pos, jnp.zeros((pad_b,), jnp.int32)])

    sq = jnp.sum(jnp.square(x_pad.astype(jnp.float32)), axis=1)      # (B_pad,)
    col_is_pad = jnp.arange(B_pad) >= B
    sq_row = jnp.where(col_is_pad, jnp.inf, sq).reshape(1, B_pad)    # pad cols -> inf dist
    sq_col = sq.reshape(B_pad, 1)
    lab_col = lab_pad.reshape(B_pad, 1)
    lab_row = lab_pad.reshape(1, B_pad)
    has_pos_col = has_pos_pad.reshape(B_pad, 1)

    grid = (B_pad // Bq,)

    def tiled(shape):            # per-anchor-tile blocks
        return pl.BlockSpec(shape, lambda i: (i, 0))

    def resident(shape):         # fetched once, constant index_map
        return pl.BlockSpec(shape, lambda i: (0, 0))
    # TODO(synk): on v7x, pipeline_mode=pl.Buffered(1) on the resident inputs
    # would save one extra (B_pad, D_pad) VMEM buffer.

    itemsize = x_pad.dtype.itemsize
    vmem_est = (2 * Bq * D_pad * itemsize          # double-buffered anchor tile
                + 2 * B_pad * D_pad * itemsize     # resident embeddings (worst case)
                + 6 * Bq * B_pad * 4               # live (Bq, B_pad) f32 temps
                + 10 * B_pad * 4)
    vmem_limit = None
    if vmem_est > 16 * 1024 * 1024:                # only raise past v5e's default
        vmem_limit = min(int(vmem_est * 5 // 4), 96 * 1024 * 1024)

    cost = pl.CostEstimate(
        flops=2 * B_pad * B_pad * D_pad + 12 * B_pad * B_pad,
        transcendentals=B_pad,                     # only the (Bq,1) hp sqrts
        bytes_accessed=2 * B_pad * D_pad * itemsize + 10 * B_pad * 4,
    )

    kernel = functools.partial(_triplet_partials_kernel, margin)
    hp_sq, hn_all_sq, hn_semi_sq = pl.pallas_call(
        kernel,
        grid=grid,
        in_specs=[tiled((Bq, D_pad)),          # anchor embedding tile
                  resident((B_pad, D_pad)),    # full embeddings
                  tiled((Bq, 1)),              # anchor norms
                  resident((1, B_pad)),        # column norms (+inf on pads)
                  tiled((Bq, 1)),              # anchor labels
                  resident((1, B_pad)),        # column labels (sentinel on pads)
                  tiled((Bq, 1))],             # anchor-has-positive flag
        out_specs=(tiled((Bq, 1)), tiled((Bq, 1)), tiled((Bq, 1))),
        out_shape=(jax.ShapeDtypeStruct((B_pad, 1), jnp.float32),
                   jax.ShapeDtypeStruct((B_pad, 1), jnp.float32),
                   jax.ShapeDtypeStruct((B_pad, 1), jnp.float32)),
        compiler_params=pltpu.CompilerParams(
            dimension_semantics=("parallel",),
            vmem_limit_bytes=vmem_limit),
        cost_estimate=cost,
    )(x_pad, x_pad, sq_col, sq_row, lab_col, lab_row, has_pos_col)

    # ---------- global combine (O(B), plain XLA) ----------
    hp_sq = hp_sq[:B, 0]
    hn_all_sq = hn_all_sq[:B, 0]
    hn_semi_sq = hn_semi_sq[:B, 0]

    # Global branch, as in the reference: if ANY anchor has a semi-hard
    # negative, every anchor uses the semi-hard min (inf -> zero loss).
    has_semi = jnp.any(hn_semi_sq < jnp.inf)
    hn = jnp.sqrt(jnp.where(has_semi, hn_semi_sq, hn_all_sq))
    hp = jnp.sqrt(hp_sq)

    loss_row = jnp.maximum(hp - hn + margin, 0.0)
    valid = (has_pos > 0).astype(jnp.float32)
    num_valid = jnp.sum(valid)
    # TODO(synk): the reference's Python-level early return for num_valid == 0
    # is replaced by a jnp.where select (same values, no host branch).
    loss = jnp.where(num_valid > 0.0,
                     jnp.sum(loss_row * valid) / jnp.maximum(num_valid, 1.0),
                     jnp.float32(0.0))
    return loss, num_valid.astype(jnp.int32)


if __name__ == "__main__":
    key = jax.random.PRNGKey(0)
    k1, k2 = jax.random.split(key)
    B, D = 8, 32
    embeddings = jax.random.normal(k1, (B, D), dtype=jnp.float32)
    labels = jax.random.randint(k2, (B,), 0, 3)   # 3 classes -> positives & negatives exist

    loss, num_valid = jax.jit(triplet_loss)(embeddings, labels)
    jax.block_until_ready((loss, num_valid))
    print("KERNEL_OK")
</pallas_src>

<mosaic_0001>
module attributes {stable_mosaic.version = 11 : i64} {
  func.func @_triplet_partials_kernel(%arg0: i32, %arg1: memref<128x128xf32, #tpu.memory_space<vmem>>, %arg2: memref<128x128xf32, #tpu.memory_space<vmem>>, %arg3: memref<128x1xf32, #tpu.memory_space<vmem>>, %arg4: memref<1x128xf32, #tpu.memory_space<vmem>>, %arg5: memref<128x1xi32, #tpu.memory_space<vmem>>, %arg6: memref<1x128xi32, #tpu.memory_space<vmem>>, %arg7: memref<128x1xi32, #tpu.memory_space<vmem>>, %arg8: memref<128x1xf32, #tpu.memory_space<vmem>>, %arg9: memref<128x1xf32, #tpu.memory_space<vmem>>, %arg10: memref<128x1xf32, #tpu.memory_space<vmem>>) attributes {dimension_semantics = [#tpu.dimension_semantics<parallel>], iteration_bounds = array<i64: 1>, scalar_prefetch = 0 : i64, scratch_operands = 0 : i64, tpu.core_type = #tpu.core_type<tc>, window_params = [{transform_indices = @transform_0, window_bounds = array<i64: 128, 128>}, {pipeline_mode = #tpu.pipeline_mode<synchronous>, transform_indices = @transform_1, window_bounds = array<i64: 128, 128>}, {transform_indices = @transform_2, window_bounds = array<i64: 128, 1>}, {pipeline_mode = #tpu.pipeline_mode<synchronous>, transform_indices = @transform_3, window_bounds = array<i64: 1, 128>}, {transform_indices = @transform_4, window_bounds = array<i64: 128, 1>}, {pipeline_mode = #tpu.pipeline_mode<synchronous>, transform_indices = @transform_5, window_bounds = array<i64: 1, 128>}, {transform_indices = @transform_6, window_bounds = array<i64: 128, 1>}, {transform_indices = @transform_7, window_bounds = array<i64: 128, 1>}, {transform_indices = @transform_8, window_bounds = array<i64: 128, 1>}, {transform_indices = @transform_9, window_bounds = array<i64: 128, 1>}]} {
    %c0 = arith.constant 0 : index
    %c0_0 = arith.constant 0 : index
    %0 = vector.load %arg1[%c0, %c0_0] : memref<128x128xf32, #tpu.memory_space<vmem>>, vector<128x128xf32>
    %c0_1 = arith.constant 0 : index
    %c0_2 = arith.constant 0 : index
    %1 = vector.load %arg2[%c0_1, %c0_2] : memref<128x128xf32, #tpu.memory_space<vmem>>, vector<128x128xf32>
    %cst = arith.constant dense<0.000000e+00> : vector<128x128xf32>
    %2 = tpu.matmul %0, %1, %cst {dimension_numbers = #tpu.dot_dimension_numbers<[1], [1], [0], [0], [0, 0, 1, 0], [], []>} : vector<128x128xf32>, vector<128x128xf32>, vector<128x128xf32> -> vector<128x128xf32>
    %c0_3 = arith.constant 0 : index
    %c0_4 = arith.constant 0 : index
    %3 = vector.load %arg3[%c0_3, %c0_4] : memref<128x1xf32, #tpu.memory_space<vmem>>, vector<128x1xf32>
    %c0_5 = arith.constant 0 : index
    %c0_6 = arith.constant 0 : index
    %4 = vector.load %arg4[%c0_5, %c0_6] : memref<1x128xf32, #tpu.memory_space<vmem>>, vector<1x128xf32>
    %5 = vector.broadcast %3 : vector<128x1xf32> to vector<128x128xf32>
    %6 = vector.broadcast %4 : vector<1x128xf32> to vector<128x128xf32>
    %7 = arith.addf %5, %6 : vector<128x128xf32>
    %cst_7 = arith.constant 2.000000e+00 : f32
    %8 = vector.broadcast %cst_7 : f32 to vector<128x128xf32>
    %9 = arith.mulf %8, %2 : vector<128x128xf32>
    %10 = arith.subf %7, %9 : vector<128x128xf32>
    %cst_8 = arith.constant 0.000000e+00 : f32
    %11 = vector.broadcast %cst_8 : f32 to vector<128x128xf32>
    %12 = arith.maximumf %10, %11 : vector<128x128xf32>
    %c0_9 = arith.constant 0 : index
    %c0_10 = arith.constant 0 : index
    %13 = vector.load %arg6[%c0_9, %c0_10] : memref<1x128xi32, #tpu.memory_space<vmem>>, vector<1x128xi32>
    %c0_11 = arith.constant 0 : index
    %c0_12 = arith.constant 0 : index
    %14 = vector.load %arg5[%c0_11, %c0_12] : memref<128x1xi32, #tpu.memory_space<vmem>>, vector<128x1xi32>
    %15 = vector.broadcast %13 : vector<1x128xi32> to vector<128x128xi32>
    %16 = vector.broadcast %14 : vector<128x1xi32> to vector<128x128xi32>
    %17 = arith.cmpi eq, %15, %16 : vector<128x128xi32>
    %cst_13 = arith.constant 0.000000e+00 : f32
    %18 = vector.broadcast %cst_13 : f32 to vector<128x128xf32>
    %19 = arith.select %17, %12, %18 : vector<128x128xi1>, vector<128x128xf32>
    %cst_14 = arith.constant dense<0xFF800000> : vector<128xf32>
    %20 = vector.multi_reduction <maximumf>, %19, %cst_14 [1] : vector<128x128xf32> to vector<128xf32>
    %21 = vector.shape_cast %20 : vector<128xf32> to vector<128x1xf32>
    %c0_15 = arith.constant 0 : index
    %c0_16 = arith.constant 0 : index
    %22 = vector.load %arg7[%c0_15, %c0_16] : memref<128x1xi32, #tpu.memory_space<vmem>>, vector<128x1xi32>
    %c0_i32 = arith.constant 0 : i32
    %23 = vector.broadcast %c0_i32 : i32 to vector<128x1xi32>
    %24 = arith.cmpi eq, %22, %23 : vector<128x1xi32>
    %25 = math.sqrt %21 : vector<128x1xf32>
    %cst_17 = arith.constant -1.000000e+01 : f32
    %26 = vector.broadcast %cst_17 : f32 to vector<128x1xf32>
    %27 = arith.select %24, %26, %25 : vector<128x1xi1>, vector<128x1xf32>
    %cst_18 = arith.constant 0x7F800000 : f32
    %28 = vector.broadcast %cst_18 : f32 to vector<128x128xf32>
    %29 = arith.select %17, %28, %12 : vector<128x128xi1>, vector<128x128xf32>
    %cst_19 = arith.constant dense<0x7F800000> : vector<128xf32>
    %30 = vector.multi_reduction <minimumf>, %29, %cst_19 [1] : vector<128x128xf32> to vector<128xf32>
    %31 = vector.shape_cast %30 : vector<128xf32> to vector<128x1xf32>
    %cst_20 = arith.constant 0.000000e+00 : f32
    %32 = vector.broadcast %cst_20 : f32 to vector<128x1xf32>
    %33 = arith.select %24, %32, %21 : vector<128x1xi1>, vector<128x1xf32>
    %cst_21 = arith.constant 1.000000e+00 : f32
    %34 = vector.broadcast %cst_21 : f32 to vector<128x1xf32>
    %35 = arith.addf %27, %34 : vector<128x1xf32>
    %cst_22 = arith.constant 0.000000e+00 : f32
    %36 = vector.broadcast %cst_22 : f32 to vector<128x1xf32>
    %37 = arith.cmpf ogt, %35, %36 : vector<128x1xf32>
    %38 = arith.mulf %35, %35 : vector<128x1xf32>
    %cst_23 = arith.constant 0.000000e+00 : f32
    %cst_24 = arith.constant 0x7F800000 : f32
    %39 = arith.subf %cst_23, %cst_24 : f32
    %40 = vector.broadcast %39 : f32 to vector<128x1xf32>
    %41 = arith.select %37, %38, %40 : vector<128x1xi1>, vector<128x1xf32>
    %42 = vector.broadcast %33 : vector<128x1xf32> to vector<128x128xf32>
    %43 = arith.cmpf ogt, %29, %42 : vector<128x128xf32>
    %44 = vector.broadcast %41 : vector<128x1xf32> to vector<128x128xf32>
    %45 = arith.cmpf olt, %29, %44 : vector<128x128xf32>
    %46 = arith.andi %43, %45 : vector<128x128xi1>
    %cst_25 = arith.constant 0x7F800000 : f32
    %47 = vector.broadcast %cst_25 : f32 to vector<128x128xf32>
    %48 = arith.select %46, %29, %47 : vector<128x128xi1>, vector<128x128xf32>
    %cst_26 = arith.constant dense<0x7F800000> : vector<128xf32>
    %49 = vector.multi_reduction <minimumf>, %48, %cst_26 [1] : vector<128x128xf32> to vector<128xf32>
    %50 = vector.shape_cast %49 : vector<128xf32> to vector<128x1xf32>
    %c0_27 = arith.constant 0 : index
    %c0_28 = arith.constant 0 : index
    %51 = vector.load %arg8[%c0_27, %c0_28] : memref<128x1xf32, #tpu.memory_space<vmem>>, vector<128x1xf32>
    tpu.vector_store %arg8[%c0_27, %c0_28], %21 {strides = array<i32>} : memref<128x1xf32, #tpu.memory_space<vmem>>, vector<128x1xf32>,
    %c0_29 = arith.constant 0 : index
    %c0_30 = arith.constant 0 : index
    %52 = vector.load %arg9[%c0_29, %c0_30] : memref<128x1xf32, #tpu.memory_space<vmem>>, vector<128x1xf32>
    tpu.vector_store %arg9[%c0_29, %c0_30], %31 {strides = array<i32>} : memref<128x1xf32, #tpu.memory_space<vmem>>, vector<128x1xf32>,
    %c0_31 = arith.constant 0 : index
    %c0_32 = arith.constant 0 : index
    %53 = vector.load %arg10[%c0_31, %c0_32] : memref<128x1xf32, #tpu.memory_space<vmem>>, vector<128x1xf32>
    tpu.vector_store %arg10[%c0_31, %c0_32], %50 {strides = array<i32>} : memref<128x1xf32, #tpu.memory_space<vmem>>, vector<128x1xf32>,
    return
  }
  func.func @transform_0(%arg0: i32) -> (i32, i32) {
    %c0_i32 = arith.constant 0 : i32
    %c0_i32_0 = arith.constant 0 : i32
    return %arg0, %c0_i32 : i32, i32
  }
  func.func @transform_1(%arg0: i32) -> (i32, i32) {
    %c0_i32 = arith.constant 0 : i32
    %c0_i32_0 = arith.constant 0 : i32
    %c0_i32_1 = arith.constant 0 : i32
    return %c0_i32, %c0_i32_0 : i32, i32
  }
  func.func @transform_2(%arg0: i32) -> (i32, i32) {
    %c0_i32 = arith.constant 0 : i32
    %c0_i32_0 = arith.constant 0 : i32
    return %arg0, %c0_i32 : i32, i32
  }
  func.func @transform_3(%arg0: i32) -> (i32, i32) {
    %c0_i32 = arith.constant 0 : i32
    %c0_i32_0 = arith.constant 0 : i32
    %c0_i32_1 = arith.constant 0 : i32
    return %c0_i32, %c0_i32_0 : i32, i32
  }
  func.func @transform_4(%arg0: i32) -> (i32, i32) {
    %c0_i32 = arith.constant 0 : i32
    %c0_i32_0 = arith.constant 0 : i32
    return %arg0, %c0_i32 : i32, i32
  }
  func.func @transform_5(%arg0: i32) -> (i32, i32) {
    %c0_i32 = arith.constant 0 : i32
    %c0_i32_0 = arith.constant 0 : i32
    %c0_i32_1 = arith.constant 0 : i32
    return %c0_i32, %c0_i32_0 : i32, i32
  }
  func.func @transform_6(%arg0: i32) -> (i32, i32) {
    %c0_i32 = arith.constant 0 : i32
    %c0_i32_0 = arith.constant 0 : i32
    return %arg0, %c0_i32 : i32, i32
  }
  func.func @transform_7(%arg0: i32) -> (i32, i32) {
    %c0_i32 = arith.constant 0 : i32
    %c0_i32_0 = arith.constant 0 : i32
    return %arg0, %c0_i32 : i32, i32
  }
  func.func @transform_8(%arg0: i32) -> (i32, i32) {
    %c0_i32 = arith.constant 0 : i32
    %c0_i32_0 = arith.constant 0 : i32
    return %arg0, %c0_i32 : i32, i32
  }
  func.func @transform_9(%arg0: i32) -> (i32, i32) {
    %c0_i32 = arith.constant 0 : i32
    %c0_i32_0 = arith.constant 0 : i32
    return %arg0, %c0_i32 : i32, i32
  }
}

</mosaic_0001>

<bundles_post_ra>
// kernel: triplet_loss.1
= control target key start
LH: loop header
LB: loop body
LE: loop exit
PB: predicated region body
PF: predicated region fallthrough
CT: control target
= control target key end

     0   :  { %v1268_v2 = vmov 0   ;;  %s2377_s1 = inlined_call_operand.vmem [shape: f32[128,128], index: 1, kind: input, shape index: {}, may-alias: {0,1}]   ;;  %s2378_s2 = inlined_call_operand.vmem [shape: f32[128,1], index: 2, kind: input, shape index: {}]   ;;  %s2379_s0 = inlined_call_operand.vmem [shape: f32[128,128], index: 0, kind: input, shape index: {}, may-alias: {0,1}]   ;;  %s2380_s4 = inlined_call_operand.vmem [shape: s32[128,1], index: 4, kind: input, shape index: {}]   ;;  %s2381_s3 = inlined_call_operand.vmem [shape: f32[1,128], index: 3, kind: input, shape index: {}]   ;;  %s2382_s5 = inlined_call_operand.vmem [shape: s32[1,128], index: 5, kind: input, shape index: {}]   ;;  %s2383_s6 = inlined_call_operand.vmem [shape: s32[128,1], index: 6, kind: input, shape index: {}]   ;;  %s2384_s7 = inlined_call_operand.vmem [shape: f32[128,1], index: 7, kind: output, shape index: {0}]   ;;  %s2385_s8 = inlined_call_operand.vmem [shape: f32[128,1], index: 8, kind: output, shape index: {1}]   ;;  %s2386_s9 = inlined_call_operand.vmem [shape: f32[128,1], index: 9, kind: output, shape index: {2}]  }
   0x1   :  { %v60_v0 = vld [vmem:[%s2377_s1 + $0x78] sm:$0xff]  ;;  %v59_v1 = vld [vmem:[%s2377_s1 + $0x70] sm:$0xff]  ;;  %1235 = vset.pattern.permute.xlu1 %v1268_v2  ;;  %1234 = vset.pattern.permute.xlu0 %v1268_v2  ;;  %v58_v4 = vld [vmem:[%s2377_s1 + $0x68] sm:$0xff] }
   0x2   :  { %1145 = vmatprep.subr.mxu0 %v60_v0  ;;  %1201 = vmatprep.subr.mxu1 %v60_v0  ;;  %v208_v3 = vld [vmem:[%s2378_s2 + $0x10] sm:$0xff]  ;;  %v209_v5 = vld [vmem:[%s2378_s2 + $0x18] sm:$0xff]  ;;  %v206_v6 = vld [vmem:[%s2378_s2] sm:$0xff] }
   0x3   :  { %1146 = vmatpush3.xpose.msra.mxu0 %v60_v0  ;;  %1217 = vmatpush3.xpose.msra.mxu1 %v60_v0  ;;  %v57_v7 = vld [vmem:[%s2377_s1 + $0x60] sm:$0xff]  ;;  %v211_v8 = vld [vmem:[%s2378_s2 + $0x28] sm:$0xff]  ;;  %v56_v12 = vld [vmem:[%s2377_s1 + $0x58] sm:$0xff] }
   0x4   :  { %1147 = vmatprep.subr.mxu0 %v59_v1  ;;  %1202 = vmatprep.subr.mxu1 %v59_v1  ;;  %v207_v9 = vld [vmem:[%s2378_s2 + $0x8] sm:$0xff]  ;;  %v29_v10 = vld [vmem:[%s2379_s0] sm:$0xff]  ;;  %v213_v13 = vld [vmem:[%s2378_s2 + $0x38] sm:$0xff] }
   0x5   :  { %235 = vperm.xlu1 %1235, %v208_v3   ;;  %225 = vperm.xlu0 %1234, %v206_v6   ;;  %v37_v11 = vld [vmem:[%s2379_s0 + $0x40] sm:$0xff]  ;;  %v55_v15 = vld [vmem:[%s2377_s1 + $0x50] sm:$0xff]  ;;  %v215_v16 = vld [vmem:[%s2378_s2 + $0x48] sm:$0xff] }
   0x6   :  { %v210_v14 = vld [vmem:[%s2378_s2 + $0x20] sm:$0xff]  ;;  %1177 = vmatprep.mubr.f32.mxu0 %v29_v10  ;;  %1189 = vmatprep.mubr.f32.mxu1 %v37_v11  ;;  %v212_v17 = vld [vmem:[%s2378_s2 + $0x30] sm:$0xff]  ;;  %v54_v18 = vld [vmem:[%s2377_s1 + $0x48] sm:$0xff] }
   0x7   :  { %1148 = vmatpush3.xpose.msra.mxu0 %v59_v1  ;;  %1218 = vmatpush3.xpose.msra.mxu1 %v59_v1  ;;  %v217_v19 = vld [vmem:[%s2378_s2 + $0x58] sm:$0xff]  ;;  %v214_v20 = vld [vmem:[%s2378_s2 + $0x40] sm:$0xff]  ;;  %v219_v22 = vld [vmem:[%s2378_s2 + $0x68] sm:$0xff] }
   0x8   :  { %1149 = vmatprep.subr.mxu0 %v58_v4  ;;  %1203 = vmatprep.subr.mxu1 %v58_v4  ;;  %v53_v21 = vld [vmem:[%s2377_s1 + $0x40] sm:$0xff]  ;;  %v216_v23 = vld [vmem:[%s2378_s2 + $0x50] sm:$0xff]  ;;  %v52_v24 = vld [vmem:[%s2377_s1 + $0x38] sm:$0xff] }
   0x9   :  { %240 = vperm.xlu1 %1235, %v209_v5   ;;  %230 = vperm.xlu0 %1234, %v207_v9   ;;  %v221_v25 = vld [vmem:[%s2378_s2 + $0x78] sm:$0xff]  ;;  %v218_v26 = vld [vmem:[%s2378_s2 + $0x60] sm:$0xff]  ;;  %v51_v27 = vld [vmem:[%s2377_s1 + $0x30] sm:$0xff] }
   0xa   :  { %v375_v28 = vld [vmem:[%s2380_s4 + $0x8] sm:$0xff]  ;;  %v220_v29 = vld [vmem:[%s2378_s2 + $0x70] sm:$0xff]  ;;  %v377_v31 = vld [vmem:[%s2380_s4 + $0x18] sm:$0xff] }
   0xb   :  { %1150 = vmatpush3.xpose.msra.mxu0 %v58_v4  ;;  %1219 = vmatpush3.xpose.msra.mxu1 %v58_v4  ;;  %v50_v30 = vld [vmem:[%s2377_s1 + $0x28] sm:$0xff]  ;;  %v374_v32 = vld [vmem:[%s2380_s4] sm:$0xff]  ;;  %v376_v35 = vld [vmem:[%s2380_s4 + $0x10] sm:$0xff] }
   0xc   :  { %1151 = vmatprep.subr.mxu0 %v57_v7  ;;  %1204 = vmatprep.subr.mxu1 %v57_v7  ;;  %v49_v33 = vld [vmem:[%s2377_s1 + $0x20] sm:$0xff]  ;;  %v379_v34 = vld [vmem:[%s2380_s4 + $0x28] sm:$0xff]  ;;  %v48_v36 = vld [vmem:[%s2377_s1 + $0x18] sm:$0xff] }
   0xd   :  { %250 = vperm.xlu1 %1235, %v211_v8   ;;  %245 = vperm.xlu0 %1234, %v210_v14   ;;  %v381_v37 = vld [vmem:[%s2380_s4 + $0x38] sm:$0xff]  ;;  %v378_v38 = vld [vmem:[%s2380_s4 + $0x20] sm:$0xff]  ;;  %v47_v39 = vld [vmem:[%s2377_s1 + $0x10] sm:$0xff] }
   0xe   :  { %v383_v40 = vld [vmem:[%s2380_s4 + $0x48] sm:$0xff]  ;;  %v380_v41 = vld [vmem:[%s2380_s4 + $0x30] sm:$0xff]  ;;  %v385_v43 = vld [vmem:[%s2380_s4 + $0x58] sm:$0xff] }
   0xf   :  { %1152 = vmatpush3.xpose.msra.mxu0 %v57_v7  ;;  %1220 = vmatpush3.xpose.msra.mxu1 %v57_v7  ;;  %v46_v42 = vld [vmem:[%s2377_s1 + $0x8] sm:$0xff]  ;;  %v382_v44 = vld [vmem:[%s2380_s4 + $0x40] sm:$0xff]  ;;  %v384_v47 = vld [vmem:[%s2380_s4 + $0x50] sm:$0xff] }
  0x10   :  { %1153 = vmatprep.subr.mxu0 %v56_v12  ;;  %1205 = vmatprep.subr.mxu1 %v56_v12  ;;  %v45_v45 = vld [vmem:[%s2377_s1] sm:$0xff]  ;;  %v387_v46 = vld [vmem:[%s2380_s4 + $0x68] sm:$0xff]  ;;  %v389_v48 = vld [vmem:[%s2380_s4 + $0x78] sm:$0xff] }
  0x11   :  { %260 = vperm.xlu1 %1235, %v213_v13   ;;  %255 = vperm.xlu0 %1234, %v212_v17   ;;  %v386_v49 = vld [vmem:[%s2380_s4 + $0x60] sm:$0xff]  ;;  %v30_v50 = vld [vmem:[%s2379_s0 + $0x8] sm:$0xff]  ;;  %v31_v52 = vld [vmem:[%s2379_s0 + $0x10] sm:$0xff] }
  0x12   :  { %v38_v51 = vld [vmem:[%s2379_s0 + $0x48] sm:$0xff]  ;;  %v39_v53 = vld [vmem:[%s2379_s0 + $0x50] sm:$0xff]  ;;  %v32_v55 = vld [vmem:[%s2379_s0 + $0x18] sm:$0xff] }
  0x13   :  { %1154 = vmatpush3.xpose.msra.mxu0 %v56_v12  ;;  %1221 = vmatpush3.xpose.msra.mxu1 %v56_v12  ;;  %v388_v54 = vld [vmem:[%s2380_s4 + $0x70] sm:$0xff]  ;;  %v40_v56 = vld [vmem:[%s2379_s0 + $0x58] sm:$0xff]  ;;  %v33_v57 = vld [vmem:[%s2379_s0 + $0x20] sm:$0xff] }
  0x14   :  { %1155 = vmatprep.subr.mxu0 %v55_v15  ;;  %1206 = vmatprep.subr.mxu1 %v55_v15  ;;  %v41_v58 = vld [vmem:[%s2379_s0 + $0x60] sm:$0xff]  ;;  %v34_v59 = vld [vmem:[%s2379_s0 + $0x28] sm:$0xff]  ;;  %v35_v61 = vld [vmem:[%s2379_s0 + $0x30] sm:$0xff] }
  0x15   :  { %270 = vperm.xlu1 %1235, %v215_v16   ;;  %265 = vperm.xlu0 %1234, %v214_v20   ;;  %v42_v60 = vld [vmem:[%s2379_s0 + $0x68] sm:$0xff]  ;;  %v43_v62 = vld [vmem:[%s2379_s0 + $0x70] sm:$0xff]  ;;  %v36_v63 = vld [vmem:[%s2379_s0 + $0x38] sm:$0xff] }
  0x16   :  { %v44_v0 = vld [vmem:[%s2379_s0 + $0x78] sm:$0xff] }
  0x17   :  { %1156 = vmatpush3.xpose.msra.mxu0 %v55_v15  ;;  %1222 = vmatpush3.xpose.msra.mxu1 %v55_v15 }
  0x18   :  { %1157 = vmatprep.subr.mxu0 %v54_v18  ;;  %1207 = vmatprep.subr.mxu1 %v54_v18 }
  0x19   :  { %280 = vperm.xlu1 %1235, %v217_v19   ;;  %275 = vperm.xlu0 %1234, %v216_v23  }
  0x1b   :  { %1158 = vmatpush3.xpose.msra.mxu0 %v54_v18  ;;  %1223 = vmatpush3.xpose.msra.mxu1 %v54_v18 }
  0x1c   :  { %1159 = vmatprep.subr.mxu0 %v53_v21  ;;  %1208 = vmatprep.subr.mxu1 %v53_v21 }
  0x1d   :  { %290 = vperm.xlu1 %1235, %v219_v22   ;;  %285 = vperm.xlu0 %1234, %v218_v26   ;;  %v1544_v22 = vld [vmem:[%s2381_s3] ss:$0 sm:$0xff] }
  0x1f   :  { %1160 = vmatpush3.xpose.msra.mxu0 %v53_v21  ;;  %1224 = vmatpush3.xpose.msra.mxu1 %v53_v21 }
  0x20   :  { %1161 = vmatprep.subr.mxu0 %v52_v24  ;;  %1209 = vmatprep.subr.mxu1 %v52_v24 }
  0x21   :  { %300 = vperm.xlu1 %1235, %v221_v25   ;;  %295 = vperm.xlu0 %1234, %v220_v29  }
  0x23   :  { %1162 = vmatpush3.xpose.msra.mxu0 %v52_v24  ;;  %1225 = vmatpush3.xpose.msra.mxu1 %v52_v24 }
  0x24   :  { %1163 = vmatprep.subr.mxu0 %v51_v27  ;;  %1210 = vmatprep.subr.mxu1 %v51_v27 }
  0x25   :  { %398 = vperm.xlu1 %1235, %v375_v28   ;;  %395 = vperm.xlu0 %1234, %v374_v32  }
  0x27   :  { %1164 = vmatpush3.xpose.msra.mxu0 %v51_v27  ;;  %1226 = vmatpush3.xpose.msra.mxu1 %v51_v27 }
  0x28   :  { %1165 = vmatprep.subr.mxu0 %v50_v30  ;;  %1211 = vmatprep.subr.mxu1 %v50_v30 }
  0x29   :  { %404 = vperm.xlu1 %1235, %v377_v31   ;;  %401 = vperm.xlu0 %1234, %v376_v35  }
  0x2b   :  { %1166 = vmatpush3.xpose.msra.mxu0 %v50_v30  ;;  %1227 = vmatpush3.xpose.msra.mxu1 %v50_v30 }
  0x2c   :  { %1167 = vmatprep.subr.mxu0 %v49_v33  ;;  %1212 = vmatprep.subr.mxu1 %v49_v33 }
  0x2d   :  { %410 = vperm.xlu1 %1235, %v379_v34   ;;  %407 = vperm.xlu0 %1234, %v378_v38  }
  0x2f   :  { %1168 = vmatpush3.xpose.msra.mxu0 %v49_v33  ;;  %1228 = vmatpush3.xpose.msra.mxu1 %v49_v33 }
  0x30   :  { %1169 = vmatprep.subr.mxu0 %v48_v36  ;;  %1213 = vmatprep.subr.mxu1 %v48_v36 }
  0x31   :  { %416 = vperm.xlu1 %1235, %v381_v37   ;;  %413 = vperm.xlu0 %1234, %v380_v41   ;;  %v1556_v37 = vld [vmem:[%s2382_s5] ss:$0 sm:$0xff] }
  0x33   :  { %1170 = vmatpush3.xpose.msra.mxu0 %v48_v36  ;;  %1229 = vmatpush3.xpose.msra.mxu1 %v48_v36 }
  0x34   :  { %1171 = vmatprep.subr.mxu0 %v47_v39  ;;  %1214 = vmatprep.subr.mxu1 %v47_v39 }
  0x35   :  { %422 = vperm.xlu1 %1235, %v383_v40   ;;  %419 = vperm.xlu0 %1234, %v382_v44  }
  0x37   :  { %1172 = vmatpush3.xpose.msra.mxu0 %v47_v39  ;;  %1230 = vmatpush3.xpose.msra.mxu1 %v47_v39 }
  0x38   :  { %1173 = vmatprep.subr.mxu0 %v46_v42  ;;  %1215 = vmatprep.subr.mxu1 %v46_v42 }
  0x39   :  { %428 = vperm.xlu1 %1235, %v385_v43   ;;  %425 = vperm.xlu0 %1234, %v384_v47  }
  0x3b   :  { %1174 = vmatpush3.xpose.msra.mxu0 %v46_v42  ;;  %1231 = vmatpush3.xpose.msra.mxu1 %v46_v42 }
  0x3c   :  { %1175 = vmatprep.subr.mxu0 %v45_v45  ;;  %1216 = vmatprep.subr.mxu1 %v45_v45 }
  0x3d   :  { %434 = vperm.xlu1 %1235, %v387_v46   ;;  %431 = vperm.xlu0 %1234, %v386_v49  }
  0x3f   :  { %1176 = vmatpush3.xpose.msra.mxu0 %v45_v45  ;;  %1232 = vmatpush3.xpose.msra.mxu1 %v45_v45 }
  0x41   :  { %440 = vperm.xlu1 %1235, %v389_v48   ;;  %437 = vperm.xlu0 %1234, %v388_v54  }
  0x42   :  { %1178 = vmatmul.mubr.f32.vlgmr.msra.gmra.mxu0 %v30_v50  ;;  %1190 = vmatmul.mubr.f32.vlgmr.msra.gmra.mxu1 %v38_v51 }
  0x43   :  { %1180 = vmatprep.mubr.f32.mxu0 %v31_v52  ;;  %1192 = vmatprep.mubr.f32.mxu1 %v39_v53 }
  0x46   :  { %1181 = vmatmul.mubr.f32.gmra.mxu0 %v32_v55  ;;  %1193 = vmatmul.mubr.f32.gmra.mxu1 %v40_v56 }
  0x47   :  { %1183 = vmatprep.mubr.f32.mxu0 %v33_v57  ;;  %1195 = vmatprep.mubr.f32.mxu1 %v41_v58 }
  0x4a   :  { %1184 = vmatmul.mubr.f32.gmra.mxu0 %v34_v59  ;;  %1196 = vmatmul.mubr.f32.gmra.mxu1 %v42_v60 }
  0x4b   :  { %1186 = vmatprep.mubr.f32.mxu0 %v35_v61  ;;  %1198 = vmatprep.mubr.f32.mxu1 %v43_v62 }
  0x4e   :  { %1187 = vmatmul.mubr.f32.gmra.mxu0 %v36_v63  ;;  %1199 = vmatmul.mubr.f32.gmra.mxu1 %v44_v0 }
  0x80   :  { %v1511_v1 = vpop.permute.xlu1 %235  ;;  %v226_v2 = vpop.permute.xlu0 %225 }
  0x81   :  { %v309_v42 = vadd.f32 %v1544_v22, %v226_v2 }
  0x84   :  { %v1513_v3 = vpop.permute.xlu1 %240  ;;  %v231_v4 = vpop.permute.xlu0 %230 }
  0x85   :  { %v310_v28 = vadd.f32 %v1544_v22, %v231_v4  ;;  %v312_v59 = vadd.f32 %v1544_v22, %v1513_v3 }
  0x88   :  { %v1515_v5 = vpop.permute.xlu1 %250  ;;  %v1517_v6 = vpop.permute.xlu0 %245 }
  0x8c   :  { %v1519_v7 = vpop.permute.xlu1 %260  ;;  %v1521_v8 = vpop.permute.xlu0 %255 }
  0x90   :  { %v271_v9 = vpop.permute.xlu1 %270  ;;  %v266_v10 = vpop.permute.xlu0 %265 }
  0x91   :  { %v318_v27 = vadd.f32 %v1544_v22, %v271_v9  ;;  %v317_v33 = vadd.f32 %v1544_v22, %v266_v10  ;;  %v311_v9 = vadd.f32 %v1544_v22, %v1511_v1 }
  0x94   :  { %v1523_v11 = vpop.permute.xlu1 %280  ;;  %v276_v12 = vpop.permute.xlu0 %275 }
  0x95   :  { %v319_v60 = vadd.f32 %v1544_v22, %v276_v12  ;;  %v320_v3 = vadd.f32 %v1544_v22, %v1523_v11 }
  0x98   :  { %v1525_v13 = vpop.permute.xlu1 %290  ;;  %v1527_v14 = vpop.permute.xlu0 %285 }
  0x9c   :  { %v1529_v15 = vpop.permute.xlu1 %300  ;;  %v1531_v16 = vpop.permute.xlu0 %295 }
  0xa0   :  { %v399_v17 = vpop.permute.xlu1 %398  ;;  %v1533_v18 = vpop.permute.xlu0 %395 }
  0xa1   :  { %vm443_vm0 = vcmp.eq.s32.totalorder %v1556_v37, %v399_v17  ;;  %vm442_vm3 = vcmp.eq.s32.totalorder %v1556_v37, %v1533_v18 }
  0xa4   :  { %v1535_v19 = vpop.permute.xlu1 %404  ;;  %v1537_v20 = vpop.permute.xlu0 %401 }
  0xa5   :  { %vm445_vm4 = vcmp.eq.s32.totalorder %v1556_v37, %v1535_v19  ;;  %vm444_vm7 = vcmp.eq.s32.totalorder %v1556_v37, %v1537_v20 }
  0xa8   :  { %v1539_v21 = vpop.permute.xlu1 %410  ;;  %v1546_v23 = vpop.permute.xlu0 %407 }
  0xa9   :  { %vm446_vm8 = vcmp.eq.s32.totalorder %v1556_v37, %v1546_v23  ;;  %vm447_vm10 = vcmp.eq.s32.totalorder %v1556_v37, %v1539_v21 }
  0xac   :  { %v1548_v24 = vpop.permute.xlu1 %416  ;;  %v1558_v38 = vpop.permute.xlu0 %413 }
  0xad   :  { %vm448_vm12 = vcmp.eq.s32.totalorder %v1556_v37, %v1558_v38  ;;  %vm449_vm14 = vcmp.eq.s32.totalorder %v1556_v37, %v1548_v24 }
  0xb0   :  { %v423_v43 = vpop.permute.xlu1 %422  ;;  %v420_v52 = vpop.permute.xlu0 %419 }
  0xb1   :  { %vm451_vm1 = vcmp.eq.s32.totalorder %v1556_v37, %v423_v43  ;;  %vm450_vm2 = vcmp.eq.s32.totalorder %v1556_v37, %v420_v52 }
  0xb4   :  { %v426_v1 = vpop.permute.xlu0 %425 }
  0xb5   :  { %vm452_vm5 = vcmp.eq.s32.totalorder %v1556_v37, %v426_v1 }
 0x102   :  { %v1179_v25 = vpop.f32.mrf.mxu0  ;;  %v1191_v26 = vpop.f32.mrf.mxu1 }
 0x103   :  { %v326_v29 = vmul.f32 2.0, %v1179_v25  ;;  %v334_v30 = vmul.f32 2.0, %v1191_v26 }
 0x104   :  { %v127_v31 = vpop.f32.mrf.mxu0  ;;  %v167_v32 = vpop.f32.mrf.mxu1 }
 0x105   :  { %v342_v34 = vsub.f32 %v310_v28, %v326_v29  ;;  %v350_v35 = vsub.f32 %v318_v27, %v334_v30  ;;  %v333_v36 = vmul.f32 2.0, %v167_v32  ;;  %v325_v39 = vmul.f32 2.0, %v127_v31 }
 0x106   :  { %v1194_v41 = vpop.f32.mrf.mxu1  ;;  %v1182_v47 = vpop.f32.mrf.mxu0 }
 0x107   :  { %v349_v40 = vsub.f32 %v317_v33, %v333_v36  ;;  %v366_v44 = vmax.f32 %v350_v35, 0.0  ;;  %v358_v45 = vmax.f32 %v342_v34, 0.0  ;;  %v341_v46 = vsub.f32 %v309_v42, %v325_v39  ;;  %v429_v36 = vpop.permute.xlu1 %428 }
 0x108   :  { %v177_v50 = vpop.f32.mrf.mxu1  ;;  %v328_v53 = vmul.f32 2.0, %v1182_v47  ;;  %v137_v55 = vpop.f32.mrf.mxu0  ;;  %v336_v61 = vmul.f32 2.0, %v1194_v41  ;;  %v313_v35 = vadd.f32 %v1544_v22, %v1517_v6  ;;  %vm453_vm6 = vcmp.eq.s32.totalorder %v1556_v37, %v429_v36 }
 0x109   :  { %v467_v48 = vsel %vm451_vm1, %v366_v44, 0.0  ;;  %v459_v49 = vsel %vm443_vm0, %v358_v45, 0.0  ;;  %v365_v51 = vmax.f32 %v349_v40, 0.0  ;;  %v357_v54 = vmax.f32 %v341_v46, 0.0 }
 0x10a   :  { %492 = vmax.xlane.f32.xlu0 %v467_v48  ;;  %476 = vmax.xlane.f32.xlu1 %v459_v49  ;;  %v335_v56 = vmul.f32 2.0, %v177_v50  ;;  %v1570_v57 = vsel %vm443_vm0, inf, %v358_v45  ;;  %v327_v62 = vmul.f32 2.0, %v137_v55  ;;  %v344_v63 = vsub.f32 %v312_v59, %v328_v53  ;;  %v1185_v10 = vpop.f32.mrf.mxu0  ;;  %v1197_v28 = vpop.f32.mrf.mxu1 }
 0x10b   :  { %v466_v58 = vsel %vm450_vm2, %v365_v51, 0.0  ;;  %v1582_v2 = vsel %vm451_vm1, inf, %v366_v44  ;;  %v1584_v4 = vsel %vm442_vm3, inf, %v357_v54  ;;  %v352_v12 = vsub.f32 %v320_v3, %v336_v61 }
 0x10c   :  { %v351_v0 = vsub.f32 %v319_v60, %v335_v56  ;;  %v343_v17 = vsub.f32 %v311_v9, %v327_v62  ;;  %v1594_v18 = vsel %vm450_vm2, inf, %v365_v51  ;;  %v458_v25 = vsel %vm442_vm3, %v357_v54, 0.0  ;;  %v147_v29 = vpop.f32.mrf.mxu0  ;;  %v187_v34 = vpop.f32.mrf.mxu1 }
 0x10d   :  { %v360_v27 = vmax.f32 %v344_v63, 0.0  ;;  %v329_v30 = vmul.f32 2.0, %v147_v29  ;;  %v368_v33 = vmax.f32 %v352_v12, 0.0  ;;  %v337_v40 = vmul.f32 2.0, %v187_v34 }
 0x10e   :  { %684 = vmin.xlane.f32.xlu0 %v1570_v57  ;;  %490 = vmax.xlane.f32.xlu1 %v466_v58  ;;  %v367_v26 = vmax.f32 %v351_v0, 0.0  ;;  %v359_v11 = vmax.f32 %v343_v17, 0.0  ;;  %v321_v6 = vadd.f32 %v1544_v22, %v1527_v14  ;;  %v330_v43 = vmul.f32 2.0, %v1185_v10  ;;  %v1188_v48 = vpop.f32.mrf.mxu0  ;;  %v1200_v50 = vpop.f32.mrf.mxu1 }
 0x10f   :  { %v461_v32 = vsel %vm445_vm4, %v360_v27, 0.0  ;;  %v345_v39 = vsub.f32 %v313_v35, %v329_v30  ;;  %v469_v41 = vsel %vm453_vm6, %v368_v33, 0.0  ;;  %v1623_v45 = vsel %vm445_vm4, inf, %v360_v27  ;;  %v435_v10 = vpop.permute.xlu1 %434 }
 0x110   :  { %v468_v31 = vsel %vm452_vm5, %v367_v26, 0.0  ;;  %v1615_v42 = vsel %vm444_vm7, inf, %v359_v11  ;;  %v353_v44 = vsub.f32 %v321_v6, %v337_v40  ;;  %v1627_v46 = vsel %vm452_vm5, inf, %v367_v26  ;;  %v157_v55 = vpop.f32.mrf.mxu0  ;;  %v197_v59 = vpop.f32.mrf.mxu1  ;;  %v1720_v40 = vld [vmem:[%s2383_s6 + $0x8] sm:$0xff] }
 0x111   :  { %v361_v47 = vmax.f32 %v345_v39, 0.0  ;;  %v314_v14 = vadd.f32 %v1544_v22, %v1515_v5  ;;  %v338_v49 = vmul.f32 2.0, %v1197_v28  ;;  %v1637_v51 = vsel %vm453_vm6, inf, %v368_v33  ;;  %v432_v5 = vpop.permute.xlu0 %431 }
 0x112   :  { %700 = vmin.xlane.f32.xlu0 %v1582_v2  ;;  %682 = vmin.xlane.f32.xlu1 %v1584_v4  ;;  %v369_v53 = vmax.f32 %v353_v44, 0.0  ;;  %v322_v54 = vadd.f32 %v1544_v22, %v1525_v13  ;;  %vm454_vm9 = vcmp.eq.s32.totalorder %v1556_v37, %v432_v5  ;;  %v331_v58 = vmul.f32 2.0, %v157_v55  ;;  %v1800_v55 = vld [vmem:[%s2383_s6 + $0x50] sm:$0xff] }
 0x113   :  { %v346_v19 = vsub.f32 %v314_v14, %v330_v43  ;;  %v462_v52 = vsel %vm446_vm8, %v361_v47, 0.0  ;;  %v460_v60 = vsel %vm444_vm7, %v359_v11, 0.0  ;;  %v315_v13 = vadd.f32 %v1544_v22, %v1521_v8  ;;  %v441_v34 = vpop.permute.xlu1 %440  ;;  %v1736_v43 = vld [vmem:[%s2383_s6 + $0x40] sm:$0xff] }
 0x114   :  { %v354_v56 = vsub.f32 %v322_v54, %v338_v49  ;;  %v470_v61 = vsel %vm454_vm9, %v369_v53, 0.0  ;;  %v339_v63 = vmul.f32 2.0, %v197_v59  ;;  %v1661_v20 = vsel %vm446_vm8, inf, %v361_v47 }
 0x115   :  { %v362_v62 = vmax.f32 %v346_v19, 0.0  ;;  %v347_v0 = vsub.f32 %v315_v13, %v331_v58  ;;  %v323_v8 = vadd.f32 %v1544_v22, %v1531_v16  ;;  %vm455_vm11 = vcmp.eq.s32.totalorder %v1556_v37, %v435_v10  ;;  %v438_v28 = vpop.permute.xlu0 %437  ;;  %v1857_v10 = vld [vmem:[%s2383_s6 + $0x20] sm:$0xff] }
 0x116   :  { %698 = vmin.xlane.f32.xlu1 %v1594_v18  ;;  %474 = vmax.xlane.f32.xlu0 %v458_v25  ;;  %v370_v3 = vmax.f32 %v354_v56, 0.0  ;;  %v332_v12 = vmul.f32 2.0, %v1188_v48  ;;  %v1671_v23 = vsel %vm454_vm9, inf, %v369_v53  ;;  %v316_v27 = vadd.f32 %v1544_v22, %v1519_v7  ;;  %v1808_v56 = vld [vmem:[%s2383_s6 + $0x18] sm:$0xff] }
 0x117   :  { %v463_v9 = vsel %vm447_vm10, %v362_v62, 0.0  ;;  %v363_v17 = vmax.f32 %v347_v0, 0.0  ;;  %v355_v25 = vsub.f32 %v323_v8, %v339_v63  ;;  %v340_v16 = vmul.f32 2.0, %v1200_v50 }
 0x118   :  { %v471_v26 = vsel %vm455_vm11, %v370_v3, 0.0  ;;  %v348_v29 = vsub.f32 %v316_v27, %v332_v12  ;;  %v1681_v11 = vsel %vm447_vm10, inf, %v362_v62  ;;  %v324_v7 = vadd.f32 %v1544_v22, %v1529_v15 }
 0x119   :  { %v371_v1 = vmax.f32 %v355_v25, 0.0  ;;  %v464_v30 = vsel %vm448_vm12, %v363_v17, 0.0  ;;  %vm456_vm13 = vcmp.eq.s32.totalorder %v1556_v37, %v438_v28  ;;  %v1702_v15 = vsel %vm448_vm12, inf, %v363_v17 }
 0x11a   :  { %494 = vmax.xlane.f32.xlu1 %v468_v31  ;;  %480 = vmax.xlane.f32.xlu0 %v461_v32  ;;  %v356_v31 = vsub.f32 %v324_v7, %v340_v16  ;;  %v1692_v32 = vsel %vm455_vm11, inf, %v370_v3  ;;  %v364_v33 = vmax.f32 %v348_v29, 0.0  ;;  %vm457_vm15 = vcmp.eq.s32.totalorder %v1556_v37, %v441_v34  ;;  %v1725_v37 = vld [vmem:[%s2383_s6 + $0x48] sm:$0xff] }
 0x11b   :  { %v472_v21 = vsel %vm456_vm13, %v371_v1, 0.0  ;;  %v1708_v39 = vsel %vm456_vm13, inf, %v371_v1  ;;  %vm1050_vm0 = vcmask 7168   ;;  %vm523_vm1 = vcmp.eq.s32.totalorder %v1720_v40, 0 }
 0x11c   :  { %v465_v35 = vsel %vm449_vm14, %v364_v33, 0.0  ;;  %v372_v22 = vmax.f32 %v356_v31, 0.0  ;;  %v1711_v24 = vsel %vm449_vm14, inf, %v364_v33  ;;  %vm531_vm2 = vcmp.eq.s32.totalorder %v1725_v37, 0 }
 0x11d   :  { %vm530_vm3 = vcmp.eq.s32.totalorder %v1736_v43, 0  ;;  %vm532_vm5 = vcmp.eq.s32.totalorder %v1800_v55, 0  ;;  %vm525_vm6 = vcmp.eq.s32.totalorder %v1808_v56, 0  ;;  %vm2392_vm8 = vcmp.eq.s32.totalorder %v1857_v10, 0  ;;  %v1991_v43 = vld [vmem:[%s2383_s6 + $0x38] sm:$0xff] }
 0x11e   :  { %496 = vmax.xlane.f32.xlu0 %v469_v41  ;;  %686 = vmin.xlane.f32.xlu1 %v1615_v42  ;;  %v473_v36 = vsel %vm457_vm15, %v372_v22, 0.0  ;;  %v1714_v38 = vsel %vm457_vm15, inf, %v372_v22 }
 0x122   :  { %688 = vmin.xlane.f32.xlu0 %v1623_v45  ;;  %702 = vmin.xlane.f32.xlu1 %v1627_v46 }
 0x126   :  { %704 = vmin.xlane.f32.xlu0 %v1637_v51  ;;  %482 = vmax.xlane.f32.xlu1 %v462_v52  ;;  %v1772_v52 = vld [vmem:[%s2383_s6] sm:$0xff] }
 0x127   :  { %vm522_vm4 = vcmp.eq.s32.totalorder %v1772_v52, 0 }
 0x12a   :  { %478 = vmax.xlane.f32.xlu0 %v460_v60  ;;  %498 = vmax.xlane.f32.xlu1 %v470_v61  ;;  %v1829_v60 = vld [vmem:[%s2383_s6 + $0x58] sm:$0xff] }
 0x12b   :  { %vm2390_vm7 = vcmp.eq.s32.totalorder %v1829_v60, 0 }
 0x12e   :  { %484 = vmax.xlane.f32.xlu0 %v463_v9  ;;  %690 = vmin.xlane.f32.xlu1 %v1661_v20 }
 0x132   :  { %500 = vmax.xlane.f32.xlu0 %v471_v26  ;;  %706 = vmin.xlane.f32.xlu1 %v1671_v23  ;;  %v1873_v26 = vld [vmem:[%s2383_s6 + $0x60] sm:$0xff] }
 0x133   :  { %vm2388_vm10 = vcmp.eq.s32.totalorder %v1873_v26, 0 }
 0x136   :  { %692 = vmin.xlane.f32.xlu0 %v1681_v11  ;;  %486 = vmax.xlane.f32.xlu1 %v464_v30 }
 0x13a   :  { %708 = vmin.xlane.f32.xlu0 %v1692_v32  ;;  %502 = vmax.xlane.f32.xlu1 %v472_v21  ;;  %v1902_v21 = vld [vmem:[%s2383_s6 + $0x10] sm:$0xff] }
 0x13e   :  { %488 = vmax.xlane.f32.xlu0 %v465_v35  ;;  %694 = vmin.xlane.f32.xlu1 %v1702_v15 }
 0x142   :  { %504 = vmax.xlane.f32.xlu0 %v473_v36  ;;  %710 = vmin.xlane.f32.xlu1 %v1708_v39 }
 0x146   :  { %696 = vmin.xlane.f32.xlu0 %v1711_v24 }
 0x14a   :  { %712 = vmin.xlane.f32.xlu0 %v1714_v38 }
 0x193   :  { %v1728_v41 = vpop.xlane.xlu0 %492  ;;  %v1730_v6 = vpop.xlane.xlu1 %476 }
 0x194   :  { %1060 = vst.msk [vmem:[%s2384_s7 + $0x48] sm:$0xff] %vm1050_vm0, %v1728_v41  ;;  %1052 = vst.msk [vmem:[%s2384_s7 + $0x8] sm:$0xff] %vm1050_vm0, %v1730_v6  ;;  %v715_v44 = vsel %vm523_vm1, 0.0, %v1730_v6  ;;  %v723_v47 = vsel %vm531_vm2, 0.0, %v1728_v41  ;;  %1236 = vrsqrt.f32 %v1730_v6  ;;  %vm547_vm9 = vcmp.eq.f32.partialorder %v1730_v6, inf }
 0x195   :  { %801 = vperm.xlu0 %1234, %v715_v44   ;;  %841 = vperm.xlu1 %1235, %v723_v47   ;;  %1238 = vrsqrt.f32 %v1728_v41  ;;  %v550_v7 = vand.u32 2147483648, %v1730_v6  ;;  %vm549_vm11 = vcmp.eq.f32.partialorder %v1730_v6, 0.0  ;;  %vm603_vm12 = vcmp.eq.f32.partialorder %v1728_v41, inf  ;;  %v1927_v47 = vld [vmem:[%s2383_s6 + $0x28] sm:$0xff] }
 0x196   :  { %vm605_vm14 = vcmp.eq.f32.partialorder %v1728_v41, 0.0 }
 0x197   :  { %v685_v48 = vpop.xlane.xlu0 %684  ;;  %v1755_v14 = vpop.xlane.xlu1 %490 }
 0x198   :  { %1068 = vst.msk [vmem:[%s2385_s8 + $0x8] sm:$0xff] %vm1050_vm0, %v685_v48  ;;  %1059 = vst.msk [vmem:[%s2384_s7 + $0x40] sm:$0xff] %vm1050_vm0, %v1755_v14  ;;  %v722_v49 = vsel %vm530_vm3, 0.0, %v1755_v14  ;;  %1240 = vrsqrt.f32 %v1755_v14  ;;  %vm596_vm13 = vcmp.eq.f32.partialorder %v1755_v14, inf  ;;  %vm598_vm15 = vcmp.eq.f32.partialorder %v1755_v14, 0.0 }
 0x199   :  { %836 = vperm.xlu0 %1234, %v722_v49   ;;  %v599_v48 = vand.u32 2147483648, %v1755_v14 }
 0x19b   :  { %v701_v19 = vpop.xlane.xlu0 %700  ;;  %v683_v50 = vpop.xlane.xlu1 %682 }
 0x19c   :  { %1076 = vst.msk [vmem:[%s2385_s8 + $0x48] sm:$0xff] %vm1050_vm0, %v701_v19  ;;  %1067 = vst.msk [vmem:[%s2385_s8] sm:$0xff] %vm1050_vm0, %v683_v50 }
 0x19f   :  { %v699_v53 = vpop.xlane.xlu1 %698  ;;  %v1785_v54 = vpop.xlane.xlu0 %474 }
 0x1a0   :  { %1075 = vst.msk [vmem:[%s2385_s8 + $0x40] sm:$0xff] %vm1050_vm0, %v699_v53  ;;  %1051 = vst.msk [vmem:[%s2384_s7] sm:$0xff] %vm1050_vm0, %v1785_v54  ;;  %v714_v5 = vsel %vm522_vm4, 0.0, %v1785_v54  ;;  %1242 = vrsqrt.f32 %v1785_v54 }
 0x1a1   :  { %796 = vperm.xlu1 %1235, %v714_v5   ;;  %v1237_v0 = vpop.eup %1236 }
 0x1a2   :  { %v1239_v12 = vpop.eup %1238  ;;  %v546_v17 = vmul.f32 %v1237_v0, %v1730_v6 }
 0x1a3   :  { %v1811_v58 = vpop.xlane.xlu1 %494  ;;  %v1813_v59 = vpop.xlane.xlu0 %480  ;;  %v602_v27 = vmul.f32 %v1239_v12, %v1728_v41 }
 0x1a4   :  { %1061 = vst.msk [vmem:[%s2384_s7 + $0x50] sm:$0xff] %vm1050_vm0, %v1811_v58  ;;  %1054 = vst.msk [vmem:[%s2384_s7 + $0x18] sm:$0xff] %vm1050_vm0, %v1813_v59  ;;  %v724_v61 = vsel %vm532_vm5, 0.0, %v1811_v58  ;;  %v717_v63 = vsel %vm525_vm6, 0.0, %v1813_v59  ;;  %1244 = vrsqrt.f32 %v1811_v58  ;;  %v548_v1 = vsel %vm547_vm9, %v1730_v6, %v546_v17 }
 0x1a5   :  { %846 = vperm.xlu0 %1234, %v724_v61   ;;  %811 = vperm.xlu1 %1235, %v717_v63   ;;  %v1241_v25 = vpop.eup %1240  ;;  %1246 = vrsqrt.f32 %v1813_v59  ;;  %v551_v33 = vsel %vm549_vm11, %v550_v7, %v548_v1  ;;  %v604_v34 = vsel %vm603_vm12, %v1728_v41, %v602_v27  ;;  %v606_v6 = vand.u32 2147483648, %v1728_v41  ;;  %v1942_v41 = vld [vmem:[%s2383_s6 + $0x68] sm:$0xff]  ;;  %v1952_v61 = vld [vmem:[%s2383_s6 + $0x30] sm:$0xff] }
 0x1a6   :  { %v595_v30 = vmul.f32 %v1241_v25, %v1755_v14  ;;  %vm524_vm9 = vcmp.eq.s32.totalorder %v1902_v21, 0  ;;  %v651_v49 = vsel %vm523_vm1, -10.0, %v551_v33  ;;  %vm540_vm11 = vcmp.eq.f32.partialorder %v1785_v54, inf }
 0x1a7   :  { %v1835_v62 = vpop.xlane.xlu0 %496  ;;  %v687_v13 = vpop.xlane.xlu1 %686  ;;  %v607_v19 = vsel %vm605_vm14, %v606_v6, %v604_v34  ;;  %vm2387_vm1 = vcmp.eq.s32.totalorder %v1927_v47, 0  ;;  %v543_v63 = vand.u32 2147483648, %v1785_v54  ;;  %vm542_vm12 = vcmp.eq.f32.partialorder %v1785_v54, 0.0 }
 0x1a8   :  { %1062 = vst.msk [vmem:[%s2384_s7 + $0x58] sm:$0xff] %vm1050_vm0, %v1835_v62  ;;  %1069 = vst.msk [vmem:[%s2385_s8 + $0x10] sm:$0xff] %vm1050_vm0, %v687_v13  ;;  %v725_v9 = vsel %vm2390_vm7, 0.0, %v1835_v62  ;;  %v597_v44 = vsel %vm596_vm13, %v1755_v14, %v595_v30  ;;  %vm2389_vm13 = vcmp.eq.s32.totalorder %v1942_v41, 0  ;;  %vm2391_vm14 = vcmp.eq.s32.totalorder %v1952_v61, 0 }
 0x1a9   :  { %851 = vperm.xlu1 %1235, %v725_v9   ;;  %v600_v53 = vsel %vm598_vm15, %v599_v48, %v597_v44  ;;  %v1970_v9 = vld [vmem:[%s2383_s6 + $0x70] sm:$0xff]  ;;  %vm612_vm15 = vcmp.eq.f32.partialorder %v1811_v58, 0.0  ;;  %v613_v1 = vand.u32 2147483648, %v1811_v58  ;;  %v564_v34 = vand.u32 2147483648, %v1813_v59 }
 0x1aa   :  { %v658_v12 = vsel %vm530_vm3, -10.0, %v600_v53  ;;  %vm561_vm3 = vcmp.eq.f32.partialorder %v1813_v59, inf  ;;  %v620_v44 = vand.u32 2147483648, %v1835_v62 }
 0x1ab   :  { %v689_v3 = vpop.xlane.xlu0 %688  ;;  %v703_v8 = vpop.xlane.xlu1 %702  ;;  %v2007_v30 = vadd.f32 1.0, %v658_v12 }
 0x1ac   :  { %1070 = vst.msk [vmem:[%s2385_s8 + $0x18] sm:$0xff] %vm1050_vm0, %v689_v3  ;;  %1077 = vst.msk [vmem:[%s2385_s8 + $0x50] sm:$0xff] %vm1050_vm0, %v703_v8  ;;  %v731_v3 = vadd.f32 1.0, %v651_v49  ;;  %v659_v8 = vsel %vm531_vm2, -10.0, %v607_v19  ;;  %vm610_vm2 = vcmp.eq.f32.partialorder %v1811_v58, inf  ;;  %v2029_v19 = vld [vmem:[%s2383_s6 + $0x78] sm:$0xff] }
 0x1ad   :  { %v1243_v29 = vpop.eup %1242  ;;  %vm754_vm7 = vcmp.gt.f32.partialorder %v2007_v30, 0.0 }
 0x1ae   :  { %v539_v35 = vmul.f32 %v1243_v29, %v1785_v54  ;;  %v1993_v29 = vadd.f32 1.0, %v659_v8 }
 0x1af   :  { %v705_v16 = vpop.xlane.xlu0 %704  ;;  %v1877_v28 = vpop.xlane.xlu1 %482 }
 0x1b0   :  { %1078 = vst.msk [vmem:[%s2385_s8 + $0x58] sm:$0xff] %vm1050_vm0, %v705_v16  ;;  %1055 = vst.msk [vmem:[%s2384_s7 + $0x20] sm:$0xff] %vm1050_vm0, %v1877_v28  ;;  %v718_v31 = vsel %vm2392_vm8, 0.0, %v1877_v28  ;;  %1248 = vrsqrt.f32 %v1877_v28  ;;  %v541_v14 = vsel %vm540_vm11, %v1785_v54, %v539_v35  ;;  %vm536_vm11 = vcmp.eq.s32.totalorder %v1970_v9, 0 }
 0x1b1   :  { %816 = vperm.xlu0 %1234, %v718_v31   ;;  %1250 = vrsqrt.f32 %v1835_v62  ;;  %v1245_v13 = vpop.eup %1244  ;;  %v544_v17 = vsel %vm542_vm12, %v543_v63, %v541_v14  ;;  %vm563_vm12 = vcmp.eq.f32.partialorder %v1813_v59, 0.0  ;;  %v763_v31 = vmul.f32 %v731_v3, %v731_v3 }
 0x1b2   :  { %v1247_v27 = vpop.eup %1246  ;;  %v609_v16 = vmul.f32 %v1245_v13, %v1811_v58  ;;  %v650_v7 = vsel %vm522_vm4, -10.0, %v544_v17  ;;  %vm617_vm4 = vcmp.eq.f32.partialorder %v1835_v62, inf  ;;  %v770_v13 = vmul.f32 %v2007_v30, %v2007_v30 }
 0x1b3   :  { %v1907_v22 = vpop.xlane.xlu0 %478  ;;  %v1909_v36 = vpop.xlane.xlu1 %498  ;;  %v560_v33 = vmul.f32 %v1247_v27, %v1813_v59  ;;  %v730_v53 = vadd.f32 1.0, %v650_v7 }
 0x1b4   :  { %1252 = vrsqrt.f32 %v1907_v22  ;;  %1053 = vst.msk [vmem:[%s2384_s7 + $0x10] sm:$0xff] %vm1050_vm0, %v1907_v22  ;;  %1063 = vst.msk [vmem:[%s2384_s7 + $0x60] sm:$0xff] %vm1050_vm0, %v1909_v36  ;;  %v726_v50 = vsel %vm2388_vm10, 0.0, %v1909_v36  ;;  %v716_v0 = vsel %vm524_vm9, 0.0, %v1907_v22  ;;  %vm747_vm10 = vcmp.gt.f32.partialorder %v731_v3, 0.0 }
 0x1b5   :  { %1254 = vrsqrt.f32 %v1909_v36  ;;  %856 = vperm.xlu0 %1234, %v726_v50   ;;  %806 = vperm.xlu1 %1235, %v716_v0   ;;  %v611_v52 = vsel %vm610_vm2, %v1811_v58, %v609_v16  ;;  %vm755_vm2 = vcmp.gt.f32.partialorder %v1993_v29, 0.0  ;;  %v2050_v63 = vsel %vm747_vm10, %v763_v31, -inf }
 0x1b6   :  { %v771_v0 = vmul.f32 %v1993_v29, %v1993_v29  ;;  %v614_v8 = vsel %vm612_vm15, %v613_v1, %v611_v52  ;;  %v562_v12 = vsel %vm561_vm3, %v1813_v59, %v560_v33  ;;  %vm554_vm10 = vcmp.eq.f32.partialorder %v1907_v22, inf }
 0x1b7   :  { %v1946_v40 = vpop.xlane.xlu0 %484  ;;  %v691_v5 = vpop.xlane.xlu1 %690  ;;  %vm556_vm8 = vcmp.eq.f32.partialorder %v1907_v22, 0.0  ;;  %v557_v27 = vand.u32 2147483648, %v1907_v22  ;;  %v762_v31 = vmul.f32 %v730_v53, %v730_v53  ;;  %vm568_vm15 = vcmp.eq.f32.partialorder %v1877_v28, inf }
 0x1b8   :  { %1056 = vst.msk [vmem:[%s2384_s7 + $0x28] sm:$0xff] %vm1050_vm0, %v1946_v40  ;;  %1071 = vst.msk [vmem:[%s2385_s8 + $0x20] sm:$0xff] %vm1050_vm0, %v691_v5  ;;  %v719_v25 = vsel %vm2387_vm1, 0.0, %v1946_v40  ;;  %1256 = vrsqrt.f32 %v1946_v40  ;;  %vm529_vm1 = vcmp.eq.s32.totalorder %v1991_v43, 0  ;;  %vm746_vm3 = vcmp.gt.f32.partialorder %v730_v53, 0.0 }
 0x1b9   :  { %821 = vperm.xlu1 %1235, %v719_v25   ;;  %v2091_v52 = vsel %vm755_vm2, %v771_v0, -inf  ;;  %v660_v59 = vsel %vm532_vm5, -10.0, %v614_v8  ;;  %v778_v55 = vsel %vm746_vm3, %v762_v31, -inf  ;;  %vm624_vm5 = vcmp.eq.f32.partialorder %v1909_v36, inf }
 0x1ba   :  { %vm2395_vm3 = vcmp.eq.s32.totalorder %v1873_v26, 0 }
 0x1bb   :  { %v1985_v37 = vpop.xlane.xlu0 %500  ;;  %v707_v54 = vpop.xlane.xlu1 %706 }
 0x1bc   :  { %1064 = vst.msk [vmem:[%s2384_s7 + $0x68] sm:$0xff] %vm1050_vm0, %v1985_v37  ;;  %1079 = vst.msk [vmem:[%s2385_s8 + $0x60] sm:$0xff] %vm1050_vm0, %v707_v54  ;;  %v727_v35 = vsel %vm2389_vm13, 0.0, %v1985_v37  ;;  %1258 = vrsqrt.f32 %v1985_v37  ;;  %vm619_vm13 = vcmp.eq.f32.partialorder %v1835_v62, 0.0 }
 0x1bd   :  { %v1249_v6 = vpop.eup %1248  ;;  %861 = vperm.xlu1 %1235, %v727_v35  }
 0x1be   :  { %v1251_v50 = vpop.eup %1250  ;;  %v567_v17 = vmul.f32 %v1249_v6, %v1877_v28 }
 0x1bf   :  { %v693_v48 = vpop.xlane.xlu0 %692  ;;  %v2024_v49 = vpop.xlane.xlu1 %486  ;;  %v616_v3 = vmul.f32 %v1251_v50, %v1835_v62 }
 0x1c0   :  { %1072 = vst.msk [vmem:[%s2385_s8 + $0x28] sm:$0xff] %vm1050_vm0, %v693_v48  ;;  %1260 = vrsqrt.f32 %v2024_v49  ;;  %1057 = vst.msk [vmem:[%s2384_s7 + $0x30] sm:$0xff] %vm1050_vm0, %v2024_v49  ;;  %v720_v14 = vsel %vm2391_vm14, 0.0, %v2024_v49  ;;  %vm537_vm14 = vcmp.eq.s32.totalorder %v2029_v19, 0  ;;  %v569_v35 = vsel %vm568_vm15, %v1877_v28, %v567_v17 }
 0x1c1   :  { %v1253_v5 = vpop.eup %1252  ;;  %826 = vperm.xlu0 %1234, %v720_v14   ;;  %v571_v48 = vand.u32 2147483648, %v1877_v28  ;;  %v740_v17 = vadd.f32 1.0, %v660_v59  ;;  %vm582_vm2 = vcmp.eq.f32.partialorder %v2024_v49, inf }
 0x1c2   :  { %v553_v25 = vmul.f32 %v1253_v5, %v1907_v22  ;;  %v1255_v54 = vpop.eup %1254 }
 0x1c3   :  { %v709_v58 = vpop.xlane.xlu0 %708  ;;  %v2066_v16 = vpop.xlane.xlu1 %502  ;;  %v623_v50 = vmul.f32 %v1255_v54, %v1909_v36 }
 0x1c4   :  { %v555_v1 = vsel %vm554_vm10, %v1907_v22, %v553_v25  ;;  %1080 = vst.msk [vmem:[%s2385_s8 + $0x68] sm:$0xff] %vm1050_vm0, %v709_v58  ;;  %1262 = vrsqrt.f32 %v2066_v16  ;;  %1065 = vst.msk [vmem:[%s2384_s7 + $0x70] sm:$0xff] %vm1050_vm0, %v2066_v16  ;;  %v728_v7 = vsel %vm536_vm11, 0.0, %v2066_v16  ;;  %v565_v22 = vsel %vm563_vm12, %v564_v34, %v562_v12 }
 0x1c5   :  { %v558_v33 = vsel %vm556_vm8, %v557_v27, %v555_v1  ;;  %866 = vperm.xlu0 %1234, %v728_v7   ;;  %vm570_vm10 = vcmp.eq.f32.partialorder %v1877_v28, 0.0  ;;  %v618_v34 = vsel %vm617_vm4, %v1835_v62, %v616_v3  ;;  %v653_v21 = vsel %vm525_vm6, -10.0, %v565_v22  ;;  %v1257_v0 = vpop.eup %1256 }
 0x1c6   :  { %v652_v6 = vsel %vm524_vm9, -10.0, %v558_v33  ;;  %v572_v56 = vsel %vm570_vm10, %v571_v48, %v569_v35  ;;  %v786_v12 = vsel %vm754_vm7, %v770_v13, -inf  ;;  %v621_v53 = vsel %vm619_vm13, %v620_v44, %v618_v34 }
 0x1c7   :  { %v2100_v14 = vpop.xlane.xlu0 %488  ;;  %v695_v5 = vpop.xlane.xlu1 %694  ;;  %v732_v29 = vadd.f32 1.0, %v652_v6  ;;  %vm626_vm6 = vcmp.eq.f32.partialorder %v1909_v36, 0.0  ;;  %v627_v28 = vand.u32 2147483648, %v1909_v36  ;;  %v2129_v25 = vadd.f32 1.0, %v653_v21 }
 0x1c8   :  { %1264 = vrsqrt.f32 %v2100_v14  ;;  %1058 = vst.msk [vmem:[%s2384_s7 + $0x38] sm:$0xff] %vm1050_vm0, %v2100_v14  ;;  %1073 = vst.msk [vmem:[%s2385_s8 + $0x30] sm:$0xff] %vm1050_vm0, %v695_v5  ;;  %v721_v8 = vsel %vm529_vm1, 0.0, %v2100_v14  ;;  %v625_v3 = vsel %vm624_vm5, %v1909_v36, %v623_v50  ;;  %vm575_vm8 = vcmp.eq.f32.partialorder %v1946_v40, inf }
 0x1c9   :  { %892 = vperm.xlu0 %1234, %v778_v55   ;;  %831 = vperm.xlu1 %1235, %v721_v8   ;;  %vm577_vm9 = vcmp.eq.f32.partialorder %v1946_v40, 0.0  ;;  %v1259_v27 = vpop.eup %1258  ;;  %vm2393_vm7 = vcmp.eq.s32.totalorder %v1857_v10, 0  ;;  %v574_v44 = vmul.f32 %v1257_v0, %v1946_v40  ;;  %v764_v58 = vmul.f32 %v732_v29, %v732_v29 }
 0x1ca   :  { %v654_v62 = vsel %vm2393_vm7, -10.0, %v572_v56  ;;  %vm2394_vm13 = vcmp.eq.s32.totalorder %v1829_v60, 0  ;;  %v578_v1 = vand.u32 2147483648, %v1946_v40  ;;  %vm748_vm12 = vcmp.gt.f32.partialorder %v732_v29, 0.0 }
 0x1cb   :  { %v2134_v30 = vpop.xlane.xlu0 %504  ;;  %v711_v13 = vpop.xlane.xlu1 %710  ;;  %v661_v10 = vsel %vm2394_vm13, -10.0, %v621_v53  ;;  %v628_v31 = vsel %vm626_vm6, %v627_v28, %v625_v3  ;;  %vm756_vm4 = vcmp.gt.f32.partialorder %v740_v17, 0.0  ;;  %v772_v33 = vmul.f32 %v740_v17, %v740_v17 }
 0x1cc   :  { %1266 = vrsqrt.f32 %v2134_v30  ;;  %1066 = vst.msk [vmem:[%s2384_s7 + $0x78] sm:$0xff] %vm1050_vm0, %v2134_v30  ;;  %1081 = vst.msk [vmem:[%s2385_s8 + $0x70] sm:$0xff] %vm1050_vm0, %v711_v13  ;;  %v729_v7 = vsel %vm537_vm14, 0.0, %v2134_v30  ;;  %v734_v35 = vadd.f32 1.0, %v654_v62  ;;  %v585_v60 = vand.u32 2147483648, %v2024_v49 }
 0x1cd   :  { %v1261_v54 = vpop.eup %1260  ;;  %932 = vperm.xlu0 %1234, %v786_v12   ;;  %871 = vperm.xlu1 %1235, %v729_v7   ;;  %vm749_vm15 = vcmp.gt.f32.partialorder %v2129_v25, 0.0  ;;  %v576_v59 = vsel %vm575_vm8, %v1946_v40, %v574_v44  ;;  %v630_v36 = vmul.f32 %v1259_v27, %v1985_v37  ;;  %v780_v48 = vsel %vm748_vm12, %v764_v58, -inf }
 0x1ce   :  { %v581_v22 = vmul.f32 %v1261_v54, %v2024_v49  ;;  %v741_v5 = vadd.f32 1.0, %v661_v10  ;;  %v662_v21 = vsel %vm2395_vm3, -10.0, %v628_v31  ;;  %vm631_vm10 = vcmp.eq.f32.partialorder %v1985_v37, inf }
 0x1cf   :  { %v697_v6 = vpop.xlane.xlu0 %696  ;;  %vm584_vm5 = vcmp.eq.f32.partialorder %v2024_v49, 0.0  ;;  %vm633_vm6 = vcmp.eq.f32.partialorder %v1985_v37, 0.0  ;;  %v788_v0 = vsel %vm756_vm4, %v772_v33, -inf  ;;  %v579_v56 = vsel %vm577_vm9, %v578_v1, %v576_v59 }
 0x1d0   :  { %v583_v34 = vsel %vm582_vm2, %v2024_v49, %v581_v22  ;;  %1074 = vst.msk [vmem:[%s2385_s8 + $0x38] sm:$0xff] %vm1050_vm0, %v697_v6  ;;  %v641_v26 = vand.u32 2147483648, %v2066_v16  ;;  %vm638_vm8 = vcmp.eq.f32.partialorder %v2066_v16, inf  ;;  %v765_v49 = vmul.f32 %v2129_v25, %v2129_v25 }
 0x1d1   :  { %v1263_v50 = vpop.eup %1262  ;;  %902 = vperm.xlu0 %1234, %v780_v48   ;;  %v586_v29 = vsel %vm584_vm5, %v585_v60, %v583_v34  ;;  %897 = vperm.xlu1 %1235, %v2050_v63   ;;  %v742_v12 = vadd.f32 1.0, %v662_v21  ;;  %v632_v53 = vsel %vm631_vm10, %v1985_v37, %v630_v36  ;;  %v766_v40 = vmul.f32 %v734_v35, %v734_v35 }
 0x1d2   :  { %v637_v55 = vmul.f32 %v1263_v50, %v2066_v16  ;;  %v634_v17 = vand.u32 2147483648, %v1985_v37  ;;  %vm2396_vm9 = vcmp.eq.s32.totalorder %v1952_v61, 0  ;;  %vm640_vm7 = vcmp.eq.f32.partialorder %v2066_v16, 0.0 }
 0x1d3   :  { %v713_v8 = vpop.xlane.xlu0 %712  ;;  %v656_v3 = vsel %vm2396_vm9, -10.0, %v586_v29  ;;  %vm750_vm13 = vcmp.gt.f32.partialorder %v734_v35, 0.0  ;;  %vm2397_vm12 = vcmp.eq.s32.totalorder %v1927_v47, 0  ;;  %vm757_vm4 = vcmp.gt.f32.partialorder %v741_v5, 0.0 }
 0x1d4   :  { %v639_v28 = vsel %vm638_vm8, %v2066_v16, %v637_v55  ;;  %1082 = vst.msk [vmem:[%s2385_s8 + $0x78] sm:$0xff] %vm1050_vm0, %v713_v8  ;;  %v655_v13 = vsel %vm2397_vm12, -10.0, %v579_v56  ;;  %v635_v44 = vsel %vm633_vm6, %v634_v17, %v632_v53  ;;  %vm589_vm2 = vcmp.eq.f32.partialorder %v2100_v14, inf }
 0x1d5   :  { %v1265_v63 = vpop.eup %1264  ;;  %942 = vperm.xlu0 %1234, %v788_v0   ;;  %v642_v27 = vsel %vm640_vm7, %v641_v26, %v639_v28  ;;  %937 = vperm.xlu1 %1235, %v2091_v52   ;;  %v781_v61 = vsel %vm749_vm15, %v765_v49, -inf  ;;  %v773_v16 = vmul.f32 %v741_v5, %v741_v5  ;;  %v736_v58 = vadd.f32 1.0, %v656_v3 }
 0x1d6   :  { %v588_v62 = vmul.f32 %v1265_v63, %v2100_v14  ;;  %v782_v47 = vsel %vm750_vm13, %v766_v40, -inf  ;;  %v774_v10 = vmul.f32 %v742_v12, %v742_v12  ;;  %v735_v7 = vadd.f32 1.0, %v655_v13 }
 0x1d7   :  { %v664_v52 = vsel %vm536_vm11, -10.0, %v642_v27  ;;  %v592_v31 = vand.u32 2147483648, %v2100_v14  ;;  %vm758_vm3 = vcmp.gt.f32.partialorder %v742_v12, 0.0  ;;  %vm2398_vm10 = vcmp.eq.s32.totalorder %v1942_v41, 0 }
 0x1d8   :  { %v590_v54 = vsel %vm589_vm2, %v2100_v14, %v588_v62  ;;  %v663_v37 = vsel %vm2398_vm10, -10.0, %v635_v44  ;;  %vm591_vm15 = vcmp.eq.f32.partialorder %v2100_v14, 0.0  ;;  %vm645_vm5 = vcmp.eq.f32.partialorder %v2134_v30, inf }
 0x1d9   :  { %v1267_v1 = vpop.eup %1266  ;;  %912 = vperm.xlu0 %1234, %v782_v47   ;;  %907 = vperm.xlu1 %1235, %v781_v61   ;;  %v593_v22 = vsel %vm591_vm15, %v592_v31, %v590_v54  ;;  %v789_v33 = vsel %vm757_vm4, %v773_v16, -inf  ;;  %v744_v35 = vadd.f32 1.0, %v664_v52  ;;  %v790_v60 = vsel %vm758_vm3, %v774_v10, -inf }
 0x1da   :  { %v644_v25 = vmul.f32 %v1267_v1, %v2134_v30  ;;  %v768_v6 = vmul.f32 %v736_v58, %v736_v58  ;;  %v743_v59 = vadd.f32 1.0, %v663_v37  ;;  %v648_v36 = vand.u32 2147483648, %v2134_v30 }
 0x1db   :  { %v767_v41 = vmul.f32 %v735_v7, %v735_v7  ;;  %vm752_vm11 = vcmp.gt.f32.partialorder %v736_v58, 0.0  ;;  %v657_v14 = vsel %vm529_vm1, -10.0, %v593_v22  ;;  %vm647_vm6 = vcmp.eq.f32.partialorder %v2134_v30, 0.0 }
 0x1dc   :  { %v646_v9 = vsel %vm645_vm5, %v2134_v30, %v644_v25  ;;  %vm751_vm8 = vcmp.gt.f32.partialorder %v735_v7, 0.0  ;;  %v784_v48 = vsel %vm752_vm11, %v768_v6, -inf  ;;  %v776_v50 = vmul.f32 %v744_v35, %v744_v35 }
 0x1dd   :  { %952 = vperm.xlu0 %1234, %v790_v60   ;;  %947 = vperm.xlu1 %1235, %v789_v33   ;;  %v649_v34 = vsel %vm647_vm6, %v648_v36, %v646_v9  ;;  %v737_v5 = vadd.f32 1.0, %v657_v14  ;;  %v783_v21 = vsel %vm751_vm8, %v767_v41, -inf  ;;  %v775_v29 = vmul.f32 %v743_v59, %v743_v59 }
 0x1de   :  { %vm760_vm9 = vcmp.gt.f32.partialorder %v744_v35, 0.0  ;;  %v665_v55 = vsel %vm537_vm14, -10.0, %v649_v34  ;;  %vm759_vm7 = vcmp.gt.f32.partialorder %v743_v59, 0.0 }
 0x1df   :  { %v792_v0 = vsel %vm760_vm9, %v776_v50, -inf  ;;  %v745_v43 = vadd.f32 1.0, %v665_v55  ;;  %v791_v56 = vsel %vm759_vm7, %v775_v29, -inf  ;;  %v769_v30 = vmul.f32 %v737_v5, %v737_v5 }
 0x1e0   :  { %vm753_vm1 = vcmp.gt.f32.partialorder %v737_v5, 0.0 }
 0x1e1   :  { %922 = vperm.xlu0 %1234, %v784_v48   ;;  %917 = vperm.xlu1 %1235, %v783_v21   ;;  %v785_v26 = vsel %vm753_vm1, %v769_v30, -inf  ;;  %v777_v8 = vmul.f32 %v745_v43, %v745_v43  ;;  %vm761_vm13 = vcmp.gt.f32.partialorder %v745_v43, 0.0 }
 0x1e3   :  { %v793_v49 = vsel %vm761_vm13, %v777_v8, -inf }
 0x1e5   :  { %962 = vperm.xlu0 %1234, %v792_v0   ;;  %957 = vperm.xlu1 %1235, %v791_v56  }
 0x1e9   :  { %927 = vperm.xlu1 %1235, %v785_v26  }
 0x1ed   :  { %967 = vperm.xlu1 %1235, %v793_v49  }
 0x210   :  { %v842_v12 = vpop.permute.xlu1 %841  ;;  %v802_v53 = vpop.permute.xlu0 %801 }
 0x211   :  { %vm875_vm14 = vcmp.gt.f32.partialorder %v1570_v57, %v802_v53  ;;  %vm883_vm5 = vcmp.gt.f32.partialorder %v1582_v2, %v842_v12 }
 0x214   :  { %v837_v19 = vpop.permute.xlu0 %836 }
 0x215   :  { %vm882_vm3 = vcmp.gt.f32.partialorder %v1594_v18, %v837_v19 }
 0x21c   :  { %v797_v28 = vpop.permute.xlu1 %796 }
 0x21d   :  { %vm874_vm8 = vcmp.gt.f32.partialorder %v1584_v4, %v797_v28 }
 0x220   :  { %v812_v40 = vpop.permute.xlu1 %811  ;;  %v847_v63 = vpop.permute.xlu0 %846 }
 0x221   :  { %vm884_vm7 = vcmp.gt.f32.partialorder %v1627_v46, %v847_v63 }
 0x224   :  { %v852_v17 = vpop.permute.xlu1 %851 }
 0x22c   :  { %v817_v3 = vpop.permute.xlu0 %816 }
 0x230   :  { %v2220_v13 = vpop.permute.xlu1 %806  ;;  %v857_v27 = vpop.permute.xlu0 %856 }
 0x234   :  { %v2222_v62 = vpop.permute.xlu1 %821 }
 0x238   :  { %v2228_v16 = vpop.permute.xlu1 %861 }
 0x23c   :  { %v2224_v44 = vpop.permute.xlu0 %826 }
 0x240   :  { %v2226_v61 = vpop.permute.xlu0 %866 }
 0x244   :  { %v893_v58 = vpop.permute.xlu0 %892  ;;  %v2230_v54 = vpop.permute.xlu1 %831 }
 0x245   :  { %vm970_vm10 = vcmp.lt.f32.partialorder %v1584_v4, %v893_v58 }
 0x246   :  { %vm2245_vm1 = vmand %vm874_vm8, %vm970_vm10 }
 0x248   :  { %v933_v47 = vpop.permute.xlu0 %932  ;;  %v2232_v10 = vpop.permute.xlu1 %871 }
 0x249   :  { %vm978_vm12 = vcmp.lt.f32.partialorder %v1594_v18, %v933_v47 }
 0x24a   :  { %vm994_vm15 = vmand %vm882_vm3, %vm978_vm12 }
 0x24b   :  { %v1010_v22 = vsel %vm994_vm15, %v1594_v18, inf }
 0x24c   :  { %v903_v1 = vpop.permute.xlu0 %902  ;;  %v898_v7 = vpop.permute.xlu1 %897 }
 0x24d   :  { %vm971_vm4 = vcmp.lt.f32.partialorder %v1570_v57, %v898_v7 }
 0x24e   :  { %vm987_vm2 = vmand %vm875_vm14, %vm971_vm4  ;;  %vm878_vm4 = vcmp.gt.f32.partialorder %v1661_v20, %v817_v3 }
 0x24f   :  { %v1003_v31 = vsel %vm987_vm2, %v1570_v57, inf  ;;  %vm877_vm2 = vcmp.gt.f32.partialorder %v1623_v45, %v812_v40 }
 0x250   :  { %v943_v52 = vpop.permute.xlu0 %942  ;;  %1020 = vmin.xlane.f32.xlu1 %v1003_v31  ;;  %v938_v37 = vpop.permute.xlu1 %937 }
 0x251   :  { %vm980_vm11 = vcmp.lt.f32.partialorder %v1627_v46, %v943_v52  ;;  %vm979_vm6 = vcmp.lt.f32.partialorder %v1582_v2, %v938_v37 }
 0x252   :  { %vm995_vm9 = vmand %vm883_vm5, %vm979_vm6  ;;  %vm885_vm6 = vcmp.gt.f32.partialorder %v1637_v51, %v852_v17 }
 0x253   :  { %v1011_v33 = vsel %vm995_vm9, %v1582_v2, inf  ;;  %vm996_vm13 = vmand %vm884_vm7, %vm980_vm11  ;;  %v1002_v2 = vsel %vm2245_vm1, %v1584_v4, inf  ;;  %vm886_vm11 = vcmp.gt.f32.partialorder %v1671_v23, %v857_v27  ;;  %vm972_vm9 = vcmp.lt.f32.partialorder %v1615_v42, %v903_v1 }
 0x254   :  { %v913_v57 = vpop.permute.xlu0 %912  ;;  %1034 = vmin.xlane.f32.xlu1 %v1010_v22  ;;  %1036 = vmin.xlane.f32.xlu0 %v1011_v33  ;;  %v908_v35 = vpop.permute.xlu1 %907  ;;  %v1012_v18 = vsel %vm996_vm13, %v1627_v46, inf  ;;  %vm876_vm13 = vcmp.gt.f32.partialorder %v1615_v42, %v2220_v13 }
 0x255   :  { %vm974_vm14 = vcmp.lt.f32.partialorder %v1661_v20, %v913_v57  ;;  %vm973_vm12 = vcmp.lt.f32.partialorder %v1623_v45, %v908_v35 }
 0x256   :  { %vm2255_vm3 = vmand %vm878_vm4, %vm974_vm14  ;;  %vm880_vm14 = vcmp.gt.f32.partialorder %v1702_v15, %v2224_v44 }
 0x257   :  { %vm989_vm10 = vmand %vm877_vm2, %vm973_vm12  ;;  %v1006_v4 = vsel %vm2255_vm3, %v1661_v20, inf }
 0x258   :  { %v953_v60 = vpop.permute.xlu0 %952  ;;  %1038 = vmin.xlane.f32.xlu1 %v1012_v18  ;;  %1018 = vmin.xlane.f32.xlu0 %v1002_v2  ;;  %v948_v6 = vpop.permute.xlu1 %947  ;;  %v1005_v36 = vsel %vm989_vm10, %v1623_v45, inf  ;;  %vm2281_vm12 = vmand %vm876_vm13, %vm972_vm9  ;;  %vm879_vm10 = vcmp.gt.f32.partialorder %v1681_v11, %v2222_v62 }
 0x259   :  { %vm982_vm15 = vcmp.lt.f32.partialorder %v1671_v23, %v953_v60  ;;  %vm981_vm5 = vcmp.lt.f32.partialorder %v1637_v51, %v948_v6 }
 0x25a   :  { %vm2267_vm8 = vmand %vm886_vm11, %vm982_vm15  ;;  %vm888_vm15 = vcmp.gt.f32.partialorder %v1708_v39, %v2226_v61 }
 0x25b   :  { %vm997_vm7 = vmand %vm885_vm6, %vm981_vm5  ;;  %v1014_v45 = vsel %vm2267_vm8, %v1671_v23, inf  ;;  %vm887_vm8 = vcmp.gt.f32.partialorder %v1692_v32, %v2228_v16 }
 0x25c   :  { %v923_v46 = vpop.permute.xlu0 %922  ;;  %1026 = vmin.xlane.f32.xlu1 %v1006_v4  ;;  %1024 = vmin.xlane.f32.xlu0 %v1005_v36  ;;  %v918_v41 = vpop.permute.xlu1 %917  ;;  %v1013_v34 = vsel %vm997_vm7, %v1637_v51, inf  ;;  %v1004_v51 = vsel %vm2281_vm12, %v1615_v42, inf  ;;  %vm889_vm12 = vcmp.gt.f32.partialorder %v1714_v38, %v2232_v10 }
 0x25d   :  { %vm976_vm1 = vcmp.lt.f32.partialorder %v1702_v15, %v923_v46  ;;  %vm975_vm2 = vcmp.lt.f32.partialorder %v1681_v11, %v918_v41 }
 0x25e   :  { %vm992_vm4 = vmand %vm880_vm14, %vm976_vm1  ;;  %vm881_vm1 = vcmp.gt.f32.partialorder %v1711_v24, %v2230_v54 }
 0x25f   :  { %vm991_vm5 = vmand %vm879_vm10, %vm975_vm2  ;;  %v1008_v50 = vsel %vm992_vm4, %v1702_v15, inf }
 0x260   :  { %v963_v20 = vpop.permute.xlu0 %962  ;;  %1042 = vmin.xlane.f32.xlu1 %v1014_v45  ;;  %1040 = vmin.xlane.f32.xlu0 %v1013_v34  ;;  %v958_v48 = vpop.permute.xlu1 %957  ;;  %v1007_v21 = vsel %vm991_vm5, %v1681_v11, inf }
 0x261   :  { %vm984_vm3 = vcmp.lt.f32.partialorder %v1708_v39, %v963_v20  ;;  %vm983_vm6 = vcmp.lt.f32.partialorder %v1692_v32, %v958_v48 }
 0x262   :  { %vm1000_vm11 = vmand %vm888_vm15, %vm984_vm3 }
 0x263   :  { %v1016_v5 = vsel %vm1000_vm11, %v1708_v39, inf  ;;  %vm999_vm9 = vmand %vm887_vm8, %vm983_vm6 }
 0x264   :  { %1030 = vmin.xlane.f32.xlu1 %v1008_v50  ;;  %1022 = vmin.xlane.f32.xlu0 %v1004_v51  ;;  %v928_v23 = vpop.permute.xlu1 %927  ;;  %v1015_v42 = vsel %vm999_vm9, %v1692_v32, inf }
 0x265   :  { %vm977_vm7 = vcmp.lt.f32.partialorder %v1711_v24, %v928_v23 }
 0x266   :  { %vm993_vm13 = vmand %vm881_vm1, %vm977_vm7 }
 0x267   :  { %v1009_v11 = vsel %vm993_vm13, %v1711_v24, inf }
 0x268   :  { %1046 = vmin.xlane.f32.xlu1 %v1016_v5  ;;  %1028 = vmin.xlane.f32.xlu0 %v1007_v21  ;;  %v968_v15 = vpop.permute.xlu1 %967 }
 0x269   :  { %vm985_vm14 = vcmp.lt.f32.partialorder %v1714_v38, %v968_v15 }
 0x26a   :  { %vm1001_vm4 = vmand %vm889_vm12, %vm985_vm14 }
 0x26b   :  { %v1017_v39 = vsel %vm1001_vm4, %v1714_v38, inf }
 0x26c   :  { %1044 = vmin.xlane.f32.xlu0 %v1015_v42 }
 0x270   :  { %1032 = vmin.xlane.f32.xlu0 %v1009_v11 }
 0x274   :  { %1048 = vmin.xlane.f32.xlu0 %v1017_v39 }
 0x2d9   :  { %v1021_v29 = vpop.xlane.xlu1 %1020 }
 0x2da   :  { %1084 = vst.msk [vmem:[%s2386_s9 + $0x8] sm:$0xff] %vm1050_vm0, %v1021_v29 }
 0x2dd   :  { %v1037_v32 = vpop.xlane.xlu0 %1036  ;;  %v1035_v55 = vpop.xlane.xlu1 %1034 }
 0x2de   :  { %1092 = vst.msk [vmem:[%s2386_s9 + $0x48] sm:$0xff] %vm1050_vm0, %v1037_v32  ;;  %1091 = vst.msk [vmem:[%s2386_s9 + $0x40] sm:$0xff] %vm1050_vm0, %v1035_v55 }
 0x2e1   :  { %v1019_v24 = vpop.xlane.xlu0 %1018  ;;  %v1039_v38 = vpop.xlane.xlu1 %1038 }
 0x2e2   :  { %1083 = vst.msk [vmem:[%s2386_s9] sm:$0xff] %vm1050_vm0, %v1019_v24  ;;  %1093 = vst.msk [vmem:[%s2386_s9 + $0x50] sm:$0xff] %vm1050_vm0, %v1039_v38 }
 0x2e5   :  { %v1025_v0 = vpop.xlane.xlu0 %1024  ;;  %v1027_v43 = vpop.xlane.xlu1 %1026 }
 0x2e6   :  { %1086 = vst.msk [vmem:[%s2386_s9 + $0x18] sm:$0xff] %vm1050_vm0, %v1025_v0  ;;  %1087 = vst.msk [vmem:[%s2386_s9 + $0x20] sm:$0xff] %vm1050_vm0, %v1027_v43 }
 0x2e9   :  { %v1041_v56 = vpop.xlane.xlu0 %1040  ;;  %v1043_v30 = vpop.xlane.xlu1 %1042 }
 0x2ea   :  { %1094 = vst.msk [vmem:[%s2386_s9 + $0x58] sm:$0xff] %vm1050_vm0, %v1041_v56  ;;  %1095 = vst.msk [vmem:[%s2386_s9 + $0x60] sm:$0xff] %vm1050_vm0, %v1043_v30 }
 0x2ed   :  { %v1023_v26 = vpop.xlane.xlu0 %1022  ;;  %v1031_v8 = vpop.xlane.xlu1 %1030 }
 0x2ee   :  { %1085 = vst.msk [vmem:[%s2386_s9 + $0x10] sm:$0xff] %vm1050_vm0, %v1023_v26  ;;  %1089 = vst.msk [vmem:[%s2386_s9 + $0x30] sm:$0xff] %vm1050_vm0, %v1031_v8 }
 0x2f1   :  { %v1029_v49 = vpop.xlane.xlu0 %1028  ;;  %v1047_v12 = vpop.xlane.xlu1 %1046 }
 0x2f2   :  { %1088 = vst.msk [vmem:[%s2386_s9 + $0x28] sm:$0xff] %vm1050_vm0, %v1029_v49  ;;  %1097 = vst.msk [vmem:[%s2386_s9 + $0x70] sm:$0xff] %vm1050_vm0, %v1047_v12 }
 0x2f5   :  { %v1045_v53 = vpop.xlane.xlu0 %1044 }
 0x2f6   :  { %1096 = vst.msk [vmem:[%s2386_s9 + $0x68] sm:$0xff] %vm1050_vm0, %v1045_v53 }
 0x2f9   :  { %v1033_v28 = vpop.xlane.xlu0 %1032 }
 0x2fa   :  { %1090 = vst.msk [vmem:[%s2386_s9 + $0x38] sm:$0xff] %vm1050_vm0, %v1033_v28 }
 0x2fd   :  { %v1049_v19 = vpop.xlane.xlu0 %1048 }
 0x2fe   :  { %1098 = vst.msk [vmem:[%s2386_s9 + $0x78] sm:$0xff] %vm1050_vm0, %v1049_v19 }

</bundles_post_ra>
